<compile_context>
chip_gen: v6e
topology: v6e:2x2x1
jax: 0.10.0
libtpu: 0.0.40
codegen_flags: <defaults>
</compile_context>

<pallas_src>
import jax
import jax.numpy as jnp
from jax.experimental import pallas as pl
from jax.experimental.pallas import tpu as pltpu

NUM_IN_CHANNELS = 15

# Double-buffered input budget per tile.  8 MiB of input (x2 buffers) plus the
# small f32 output tiles fits comfortably inside the 16 MiB scoped-VMEM default
# on v5e and the 32 MiB defaults on v6e / v7x.
_INPUT_VMEM_BUDGET_BYTES = 8 * 1024 * 1024

# Below this many output pixels, a plain XLA fusion beats pallas_call overhead.
_SMALL_FALLBACK_ELEMS = 16384


def _cdiv(a, b):
    return (a + b - 1) // b


def _round_up(x, m):
    return ((x + m - 1) // m) * m


def _conv1x1_kernel(x_ref, w_ref, b_ref, o_ref):
    # x_ref: (15, R_tile, 128) VMEM input tile (f32 or bf16)
    # w_ref: (15,)  SMEM per-channel weights (f32 scalars)
    # b_ref: (1,)   SMEM bias scalar (f32)
    # o_ref: (R_tile, 128) VMEM f32 output tile
    #
    # Pure VPU: 15 scalar-broadcast FMAs over dense (R_tile, 128) slabs, split
    # into 4 partial accumulators so the dependence chain does not serialize
    # the 4 VALU slots.  Accumulation is always in f32.
    accs = [
        x_ref[c].astype(jnp.float32) * w_ref[c] for c in range(4)
    ]
    for c in range(4, NUM_IN_CHANNELS):
        accs[c % 4] = accs[c % 4] + x_ref[c].astype(jnp.float32) * w_ref[c]
    o_ref[...] = (accs[0] + accs[1]) + (accs[2] + accs[3]) + b_ref[0]


def simple_conv_model_forward(x, weight, bias, *,
                              small_fallback_elems=_SMALL_FALLBACK_ELEMS):
    """Mirror SimpleConvModel.forward.

    x:      (B, C, H, W) with B*C == 15 (f32 or bf16; bf16 halves HBM reads)
    weight: (1, 15, 1, 1)   (PyTorch Conv2d weight layout)
    bias:   (1,)
    returns (1, H, W) float32
    """
    B, C, H, W = x.shape
    cin = B * C
    assert cin == NUM_IN_CHANNELS, "Conv2d expects 15 input channels after reshape"
    hw = H * W

    w_flat = weight.reshape(cin).astype(jnp.float32)
    b_flat = bias.reshape(1).astype(jnp.float32)

    # Small-input fallback: the whole op is a few KB; let XLA fuse it.
    if hw < small_fallback_elems:
        xf = x.reshape(cin, hw).astype(jnp.float32)
        out = jnp.sum(xf * w_flat[:, None], axis=0) + b_flat[0]
        return out.reshape(1, H, W)

    # --- Pallas path -------------------------------------------------------
    # Keep the caller's dtype for the big input read (bf16 supported); the
    # kernel accumulates in f32.
    x_flat = x.reshape(cin, hw)

    R = _cdiv(hw, 128)
    hw_pad = R * 128
    if hw_pad != hw:
        # Rare edge case (H*W not a multiple of 128): pad so the lane-dense
        # (cin, R, 128) relayout is possible.  Common shapes skip this copy.
        x_flat = jnp.pad(x_flat, ((0, 0), (0, hw_pad - hw)))
    x3 = x_flat.reshape(cin, R, 128)  # free row-major metadata reshape

    # Tile selection: rows of 128 lanes per grid step, double-buffered input
    # under _INPUT_VMEM_BUDGET_BYTES; >= 2 tiles when possible so both of
    # v7x's TensorCores get work.
    dtype_bytes = jnp.dtype(x3.dtype).itemsize
    max_rows = max(8, (_INPUT_VMEM_BUDGET_BYTES // (2 * cin * 128 * dtype_bytes)) // 8 * 8)
    n_tiles = _cdiv(R, max_rows)
    if n_tiles == 1 and R >= 16:
        n_tiles = 2
    tile_rows = _round_up(_cdiv(R, n_tiles), 8)
    if tile_rows > R:
        tile_rows = R  # full-extent block (only reachable for tiny R)
    n_grid = _cdiv(R, tile_rows)

    out2d = pl.pallas_call(
        _conv1x1_kernel,
        out_shape=jax.ShapeDtypeStruct((R, 128), jnp.float32),
        grid=(n_grid,),
        in_specs=[
            # Input: (15, tile_rows, 128) slab marching along the row axis.
            pl.BlockSpec((cin, tile_rows, 128), lambda i: (0, i, 0)),
            # Weights / bias: small scalars in SMEM, untiled.
            pl.BlockSpec(memory_space=pltpu.MemorySpace.SMEM),
            pl.BlockSpec(memory_space=pltpu.MemorySpace.SMEM),
        ],
        out_specs=pl.BlockSpec((tile_rows, 128), lambda i: (i, 0)),
        compiler_params=pltpu.CompilerParams(
            # Row tiles are independent -> shard across v7x's 2 TCs.
            dimension_semantics=("parallel",),
        ),
    )(x3, w_flat, b_flat)

    out_flat = out2d.reshape(1, hw_pad)
    if hw_pad != hw:
        out_flat = out_flat[:, :hw]  # drop pad-lane garbage; must be kept
    return out_flat.reshape(1, H, W)


def _reference(x, weight, bias):
    # Exact f32 elementwise reference (avoids TPU default-precision matmul).
    B, C, H, W = x.shape
    hw = H * W
    xf = x.reshape(B * C, hw).astype(jnp.float32)
    wf = weight.reshape(B * C, 1).astype(jnp.float32)
    return (jnp.sum(xf * wf, axis=0) + bias.astype(jnp.float32)[0]).reshape(1, H, W)


if __name__ == "__main__":
    key = jax.random.PRNGKey(0)
    k_w, k_b, k1, k2, k3, k4 = jax.random.split(key, 6)

    # Deterministic parameter init (Conv2d(15, 1, kernel_size=1) shapes).
    weight = jax.random.normal(k_w, (1, 15, 1, 1), dtype=jnp.float32) * 0.1
    bias = jax.random.normal(k_b, (1,), dtype=jnp.float32) * 0.1

    B, C = 3, 5  # B * C must equal 15

    # 1) Tiny 16x16: routed through the fused-XLA fallback path.
    x1 = jax.random.normal(k1, (B, C, 16, 16), dtype=jnp.float32)
    o1 = jax.block_until_ready(simple_conv_model_forward(x1, weight, bias))
    assert o1.shape == (1, 16, 16)
    assert jnp.allclose(o1, _reference(x1, weight, bias), atol=1e-5, rtol=1e-5)

    # 2) f32, H*W multiple of 128: zero-copy relayout, 2-tile parallel grid.
    x2 = jax.random.normal(k2, (B, C, 192, 192), dtype=jnp.float32)
    o2 = jax.block_until_ready(simple_conv_model_forward(x2, weight, bias))
    assert o2.shape == (1, 192, 192)
    assert jnp.allclose(o2, _reference(x2, weight, bias), atol=1e-5, rtol=1e-5)

    # 3) bf16 input (halved HBM read traffic), ragged last grid block (R=170).
    x3 = jax.random.normal(k3, (B, C, 160, 136), dtype=jnp.float32).astype(jnp.bfloat16)
    o3 = jax.block_until_ready(simple_conv_model_forward(x3, weight, bias))
    assert o3.shape == (1, 160, 136)
    assert jnp.allclose(o3, _reference(x3, weight, bias), atol=1e-4, rtol=1e-4)

    # 4) H*W not a multiple of 128: exercises the (rare) pad path + tail slice.
    x4 = jax.random.normal(k4, (B, C, 200, 200), dtype=jnp.float32)
    o4 = jax.block_until_ready(simple_conv_model_forward(x4, weight, bias))
    assert o4.shape == (1, 200, 200)
    assert jnp.allclose(o4, _reference(x4, weight, bias), atol=1e-5, rtol=1e-5)

    print("KERNEL_OK")
</pallas_src>

<mosaic_0001>
module attributes {stable_mosaic.version = 11 : i64} {
  func.func @_conv1x1_kernel(%arg0: i32, %arg1: memref<15x144x128xf32, #tpu.memory_space<vmem>>, %arg2: memref<15xf32, #tpu.memory_space<smem>>, %arg3: memref<1xf32, #tpu.memory_space<smem>>, %arg4: memref<144x128xf32, #tpu.memory_space<vmem>>) attributes {dimension_semantics = [#tpu.dimension_semantics<parallel>], iteration_bounds = array<i64: 2>, scalar_prefetch = 0 : i64, scratch_operands = 0 : i64, tpu.core_type = #tpu.core_type<tc>, window_params = [{transform_indices = @transform_0, window_bounds = array<i64: 15, 144, 128>}, {transform_indices = @transform_1, window_bounds = array<i64: 15>}, {transform_indices = @transform_2, window_bounds = array<i64: 1>}, {transform_indices = @transform_3, window_bounds = array<i64: 144, 128>}]} {
    %c0 = arith.constant 0 : index
    %c0_0 = arith.constant 0 : index
    %c0_1 = arith.constant 0 : index
    %0 = vector.load %arg1[%c0, %c0_0, %c0_1] : memref<15x144x128xf32, #tpu.memory_space<vmem>>, vector<1x144x128xf32>
    %1 = vector.shape_cast %0 : vector<1x144x128xf32> to vector<144x128xf32>
    %c0_2 = arith.constant 0 : index
    %2 = memref.load %arg2[%c0_2] : memref<15xf32, #tpu.memory_space<smem>>
    %3 = vector.broadcast %2 : f32 to vector<144x128xf32>
    %4 = arith.mulf %1, %3 : vector<144x128xf32>
    %c1 = arith.constant 1 : index
    %c0_3 = arith.constant 0 : index
    %c0_4 = arith.constant 0 : index
    %5 = vector.load %arg1[%c1, %c0_3, %c0_4] : memref<15x144x128xf32, #tpu.memory_space<vmem>>, vector<1x144x128xf32>
    %6 = vector.shape_cast %5 : vector<1x144x128xf32> to vector<144x128xf32>
    %c1_5 = arith.constant 1 : index
    %7 = memref.load %arg2[%c1_5] : memref<15xf32, #tpu.memory_space<smem>>
    %8 = vector.broadcast %7 : f32 to vector<144x128xf32>
    %9 = arith.mulf %6, %8 : vector<144x128xf32>
    %c2 = arith.constant 2 : index
    %c0_6 = arith.constant 0 : index
    %c0_7 = arith.constant 0 : index
    %10 = vector.load %arg1[%c2, %c0_6, %c0_7] : memref<15x144x128xf32, #tpu.memory_space<vmem>>, vector<1x144x128xf32>
    %11 = vector.shape_cast %10 : vector<1x144x128xf32> to vector<144x128xf32>
    %c2_8 = arith.constant 2 : index
    %12 = memref.load %arg2[%c2_8] : memref<15xf32, #tpu.memory_space<smem>>
    %13 = vector.broadcast %12 : f32 to vector<144x128xf32>
    %14 = arith.mulf %11, %13 : vector<144x128xf32>
    %c3 = arith.constant 3 : index
    %c0_9 = arith.constant 0 : index
    %c0_10 = arith.constant 0 : index
    %15 = vector.load %arg1[%c3, %c0_9, %c0_10] : memref<15x144x128xf32, #tpu.memory_space<vmem>>, vector<1x144x128xf32>
    %16 = vector.shape_cast %15 : vector<1x144x128xf32> to vector<144x128xf32>
    %c3_11 = arith.constant 3 : index
    %17 = memref.load %arg2[%c3_11] : memref<15xf32, #tpu.memory_space<smem>>
    %18 = vector.broadcast %17 : f32 to vector<144x128xf32>
    %19 = arith.mulf %16, %18 : vector<144x128xf32>
    %c4 = arith.constant 4 : index
    %c0_12 = arith.constant 0 : index
    %c0_13 = arith.constant 0 : index
    %20 = vector.load %arg1[%c4, %c0_12, %c0_13] : memref<15x144x128xf32, #tpu.memory_space<vmem>>, vector<1x144x128xf32>
    %21 = vector.shape_cast %20 : vector<1x144x128xf32> to vector<144x128xf32>
    %c4_14 = arith.constant 4 : index
    %22 = memref.load %arg2[%c4_14] : memref<15xf32, #tpu.memory_space<smem>>
    %23 = vector.broadcast %22 : f32 to vector<144x128xf32>
    %24 = arith.mulf %21, %23 : vector<144x128xf32>
    %25 = arith.addf %4, %24 : vector<144x128xf32>
    %c5 = arith.constant 5 : index
    %c0_15 = arith.constant 0 : index
    %c0_16 = arith.constant 0 : index
    %26 = vector.load %arg1[%c5, %c0_15, %c0_16] : memref<15x144x128xf32, #tpu.memory_space<vmem>>, vector<1x144x128xf32>
    %27 = vector.shape_cast %26 : vector<1x144x128xf32> to vector<144x128xf32>
    %c5_17 = arith.constant 5 : index
    %28 = memref.load %arg2[%c5_17] : memref<15xf32, #tpu.memory_space<smem>>
    %29 = vector.broadcast %28 : f32 to vector<144x128xf32>
    %30 = arith.mulf %27, %29 : vector<144x128xf32>
    %31 = arith.addf %9, %30 : vector<144x128xf32>
    %c6 = arith.constant 6 : index
    %c0_18 = arith.constant 0 : index
    %c0_19 = arith.constant 0 : index
    %32 = vector.load %arg1[%c6, %c0_18, %c0_19] : memref<15x144x128xf32, #tpu.memory_space<vmem>>, vector<1x144x128xf32>
    %33 = vector.shape_cast %32 : vector<1x144x128xf32> to vector<144x128xf32>
    %c6_20 = arith.constant 6 : index
    %34 = memref.load %arg2[%c6_20] : memref<15xf32, #tpu.memory_space<smem>>
    %35 = vector.broadcast %34 : f32 to vector<144x128xf32>
    %36 = arith.mulf %33, %35 : vector<144x128xf32>
    %37 = arith.addf %14, %36 : vector<144x128xf32>
    %c7 = arith.constant 7 : index
    %c0_21 = arith.constant 0 : index
    %c0_22 = arith.constant 0 : index
    %38 = vector.load %arg1[%c7, %c0_21, %c0_22] : memref<15x144x128xf32, #tpu.memory_space<vmem>>, vector<1x144x128xf32>
    %39 = vector.shape_cast %38 : vector<1x144x128xf32> to vector<144x128xf32>
    %c7_23 = arith.constant 7 : index
    %40 = memref.load %arg2[%c7_23] : memref<15xf32, #tpu.memory_space<smem>>
    %41 = vector.broadcast %40 : f32 to vector<144x128xf32>
    %42 = arith.mulf %39, %41 : vector<144x128xf32>
    %43 = arith.addf %19, %42 : vector<144x128xf32>
    %c8 = arith.constant 8 : index
    %c0_24 = arith.constant 0 : index
    %c0_25 = arith.constant 0 : index
    %44 = vector.load %arg1[%c8, %c0_24, %c0_25] : memref<15x144x128xf32, #tpu.memory_space<vmem>>, vector<1x144x128xf32>
    %45 = vector.shape_cast %44 : vector<1x144x128xf32> to vector<144x128xf32>
    %c8_26 = arith.constant 8 : index
    %46 = memref.load %arg2[%c8_26] : memref<15xf32, #tpu.memory_space<smem>>
    %47 = vector.broadcast %46 : f32 to vector<144x128xf32>
    %48 = arith.mulf %45, %47 : vector<144x128xf32>
    %49 = arith.addf %25, %48 : vector<144x128xf32>
    %c9 = arith.constant 9 : index
    %c0_27 = arith.constant 0 : index
    %c0_28 = arith.constant 0 : index
    %50 = vector.load %arg1[%c9, %c0_27, %c0_28] : memref<15x144x128xf32, #tpu.memory_space<vmem>>, vector<1x144x128xf32>
    %51 = vector.shape_cast %50 : vector<1x144x128xf32> to vector<144x128xf32>
    %c9_29 = arith.constant 9 : index
    %52 = memref.load %arg2[%c9_29] : memref<15xf32, #tpu.memory_space<smem>>
    %53 = vector.broadcast %52 : f32 to vector<144x128xf32>
    %54 = arith.mulf %51, %53 : vector<144x128xf32>
    %55 = arith.addf %31, %54 : vector<144x128xf32>
    %c10 = arith.constant 10 : index
    %c0_30 = arith.constant 0 : index
    %c0_31 = arith.constant 0 : index
    %56 = vector.load %arg1[%c10, %c0_30, %c0_31] : memref<15x144x128xf32, #tpu.memory_space<vmem>>, vector<1x144x128xf32>
    %57 = vector.shape_cast %56 : vector<1x144x128xf32> to vector<144x128xf32>
    %c10_32 = arith.constant 10 : index
    %58 = memref.load %arg2[%c10_32] : memref<15xf32, #tpu.memory_space<smem>>
    %59 = vector.broadcast %58 : f32 to vector<144x128xf32>
    %60 = arith.mulf %57, %59 : vector<144x128xf32>
    %61 = arith.addf %37, %60 : vector<144x128xf32>
    %c11 = arith.constant 11 : index
    %c0_33 = arith.constant 0 : index
    %c0_34 = arith.constant 0 : index
    %62 = vector.load %arg1[%c11, %c0_33, %c0_34] : memref<15x144x128xf32, #tpu.memory_space<vmem>>, vector<1x144x128xf32>
    %63 = vector.shape_cast %62 : vector<1x144x128xf32> to vector<144x128xf32>
    %c11_35 = arith.constant 11 : index
    %64 = memref.load %arg2[%c11_35] : memref<15xf32, #tpu.memory_space<smem>>
    %65 = vector.broadcast %64 : f32 to vector<144x128xf32>
    %66 = arith.mulf %63, %65 : vector<144x128xf32>
    %67 = arith.addf %43, %66 : vector<144x128xf32>
    %c12 = arith.constant 12 : index
    %c0_36 = arith.constant 0 : index
    %c0_37 = arith.constant 0 : index
    %68 = vector.load %arg1[%c12, %c0_36, %c0_37] : memref<15x144x128xf32, #tpu.memory_space<vmem>>, vector<1x144x128xf32>
    %69 = vector.shape_cast %68 : vector<1x144x128xf32> to vector<144x128xf32>
    %c12_38 = arith.constant 12 : index
    %70 = memref.load %arg2[%c12_38] : memref<15xf32, #tpu.memory_space<smem>>
    %71 = vector.broadcast %70 : f32 to vector<144x128xf32>
    %72 = arith.mulf %69, %71 : vector<144x128xf32>
    %73 = arith.addf %49, %72 : vector<144x128xf32>
    %c13 = arith.constant 13 : index
    %c0_39 = arith.constant 0 : index
    %c0_40 = arith.constant 0 : index
    %74 = vector.load %arg1[%c13, %c0_39, %c0_40] : memref<15x144x128xf32, #tpu.memory_space<vmem>>, vector<1x144x128xf32>
    %75 = vector.shape_cast %74 : vector<1x144x128xf32> to vector<144x128xf32>
    %c13_41 = arith.constant 13 : index
    %76 = memref.load %arg2[%c13_41] : memref<15xf32, #tpu.memory_space<smem>>
    %77 = vector.broadcast %76 : f32 to vector<144x128xf32>
    %78 = arith.mulf %75, %77 : vector<144x128xf32>
    %79 = arith.addf %55, %78 : vector<144x128xf32>
    %c14 = arith.constant 14 : index
    %c0_42 = arith.constant 0 : index
    %c0_43 = arith.constant 0 : index
    %80 = vector.load %arg1[%c14, %c0_42, %c0_43] : memref<15x144x128xf32, #tpu.memory_space<vmem>>, vector<1x144x128xf32>
    %81 = vector.shape_cast %80 : vector<1x144x128xf32> to vector<144x128xf32>
    %c14_44 = arith.constant 14 : index
    %82 = memref.load %arg2[%c14_44] : memref<15xf32, #tpu.memory_space<smem>>
    %83 = vector.broadcast %82 : f32 to vector<144x128xf32>
    %84 = arith.mulf %81, %83 : vector<144x128xf32>
    %85 = arith.addf %61, %84 : vector<144x128xf32>
    %86 = arith.addf %73, %79 : vector<144x128xf32>
    %87 = arith.addf %85, %67 : vector<144x128xf32>
    %88 = arith.addf %86, %87 : vector<144x128xf32>
    %c0_45 = arith.constant 0 : index
    %89 = memref.load %arg3[%c0_45] : memref<1xf32, #tpu.memory_space<smem>>
    %90 = vector.broadcast %89 : f32 to vector<144x128xf32>
    %91 = arith.addf %88, %90 : vector<144x128xf32>
    %c0_46 = arith.constant 0 : index
    %c0_47 = arith.constant 0 : index
    %92 = vector.load %arg4[%c0_46, %c0_47] : memref<144x128xf32, #tpu.memory_space<vmem>>, vector<144x128xf32>
    tpu.vector_store %arg4[%c0_46, %c0_47], %91 {strides = array<i32>} : memref<144x128xf32, #tpu.memory_space<vmem>>, vector<144x128xf32>,
    return
  }
  func.func @transform_0(%arg0: i32) -> (i32, i32, i32) {
    %c0_i32 = arith.constant 0 : i32
    %c0_i32_0 = arith.constant 0 : i32
    %c0_i32_1 = arith.constant 0 : i32
    return %c0_i32, %arg0, %c0_i32_0 : i32, i32, i32
  }
  func.func @transform_1(%arg0: i32) -> i32 {
    %c0_i32 = arith.constant 0 : i32
    %c0_i32_0 = arith.constant 0 : i32
    return %c0_i32 : i32
  }
  func.func @transform_2(%arg0: i32) -> i32 {
    %c0_i32 = arith.constant 0 : i32
    %c0_i32_0 = arith.constant 0 : i32
    return %c0_i32 : i32
  }
  func.func @transform_3(%arg0: i32) -> (i32, i32) {
    %c0_i32 = arith.constant 0 : i32
    %c0_i32_0 = arith.constant 0 : i32
    return %arg0, %c0_i32 : i32, i32
  }
}

</mosaic_0001>

<bundles_post_ra>
// kernel: tpu_custom_call.1
= control target key start
LH: loop header
LB: loop body
LE: loop exit
PB: predicated region body
PF: predicated region fallthrough
CT: control target
= control target key end

     0   :  { %s2480_s0 = inlined_call_operand.hbm [shape: f32[15,288,128], index: 0, kind: input, shape index: {}]   ;;  %s2481_s1 = inlined_call_operand.hbm [shape: f32[15], index: 1, kind: input, shape index: {}]   ;;  %s2482_s2 = inlined_call_operand.<no memory space> [shape: f32[1], index: 2, kind: input, shape index: {}]   ;;  %s2483_s3 = inlined_call_operand.hbm [shape: f32[288,128], index: 3, kind: output, shape index: {}]  }
   0x1   :  { %8 = sst [smem:[#allocation2]] %s2482_s2 }
   0x2   :  { %9 = vsyncpa [#allocation4], 0 }
   0x3   :  { %11 = vsyncpa [#allocation4 + $0x1], 0 }
   0x4   :  { %12 = vsyncpa [#allocation6], 0 }
   0x5   :  { %13 = vsyncpa [#allocation5], 0 }
   0x6   :  { %15 = vsyncpa [#allocation5 + $0x1], 0  ;;  %s1666_s14 = smov 0   ;;  %s1668_s15 = smov 0  }
   0x7   :  { %s1670_s16 = smov 0   ;;  %s1672_s17 = smov 0  }
   0x8 LB: > { %s1687_s2 = sadd.s32 4294967295, %s1631_s17   ;;  %s1202_s18 = sadd.s32 4294967294, %s1631_s17   ;;  %s1631_s17 = sphi %s1672_s17, %s2492_s17   ;;  %s1627_s16 = sphi %s1670_s16, %s2491_s16   ;;  %s1623_s15 = sphi %s1668_s15, %s2490_s15   ;;  %s1619_s14 = sphi %s1666_s14, %s2489_s14  }
   0x9   : > { %s1691_s19 = sadd.s32 1, %s1631_s17   ;;  %s28_s20 = sadd.s32 1, %s1627_s16 }
   0xa   : > { %s25_s21 = ssub.s32 %s1631_s17, %s1691_s19  ;;  %p35_p0 = scmp.ne.s32.totalorder %s1627_s16, %s1623_s15 }
   0xb   : > { %p26_p1 = scmp.eq.s32.totalorder %s25_s21, 0  ;;  %p36_p2 = scmp.eq.s32.totalorder %s1631_s17, 0 }
   0xc   : > { %p41_p3 = scmp.ne.s32.totalorder %s1623_s15, %s1619_s14  ;;  %p42_p4 = scmp.eq.s32.totalorder %s1687_s2, 0 }
   0xd   : > { %s1703_s22 = scalar_select %p26_p1, %s1627_s16, %s28_s20  }
   0xe   : > { %p1705_p5 = por %p36_p2, %p35_p0  ;;  %p1711_p6 = por %p42_p4, %p41_p3 }
   0xf   : > { %p107_p7 = scmp.eq.s32.totalorder %s1687_s2, 1  ;;  %p113_p8 = scmp.eq.s32.totalorder %s1202_s18, 1 }
  0x10   : > { %p1203_p9 = scmp.ge.s32.totalorder %s1631_s17, 1  ;;  %p120_p10 = scmp.lt.s32.totalorder %s1631_s17, 3 }
  0x11   : > { %p1718_p11 = por %p107_p7, %p35_p0  ;;  %p1722_p12 = por %p113_p8, %p41_p3 }
  0x12   : > { %p1726_p13 = pnand %p1203_p9, %p120_p10  ;;  %s1633_s28 = smov [#allocation7]  }
  0x13   : > { %p1205_p0 = scmp.ge.s32.totalorder %s1631_s17, 2 }
  0x14   : > { %p1500_p1 = pneg %p1726_p13 }
  0x15   : > { %141 = sbr.rel (%p1205_p0) target bundleno = 40 (0x28), region = 24 }
  0x16   : > { %p1501_p2 = pnand %p1500_p1, %p42_p4 }
  0x18   : > { %1503 = dma.hbm_to_smem (!%p1501_p2), %s2481_s1, 16, %s1633_s28, [#allocation6]  }
  0x1a   : > { %s145_s4 = sand.u32 1, %s1627_s16   ;;  %s1480_s5 = smul.u32 2304, %s1631_s17 }
  0x1b   : > { %s1482_s6 = smul.u32 2160, %s145_s4  ;;  %s1634_s7 = smov 4608  }
  0x1c   : > { %1488 = sst [smem:[#allocation10]] (%p1705_p5), %s1634_s7  ;;  %s155_s11 = scalar_lea.hbm %s2480_s0, %s1480_s5 }
  0x1d   : > { %s1487_s8 = scalar_select %p1705_p5, [#allocation0], [#allocation11] }
  0x1e   : > { %s149_s13 = scalar_lea.vmem [#allocation3], %s1482_s6  ;;  %s1635_s20 = smov 2304  }
  0x1f   : > { %s160_s12 = sld [smem:[%s1487_s8]]   ;;  %s168_s18 = sshll.u32 %s149_s13, 4  ;;  %s169_s18 = int_to_ptr.vmem [resolvable:$true] %s168_s18 }
  0x20   : > { %1489 = sst [smem:[#allocation10 + $0x1]] (%p1705_p5), %s1635_s20  ;;  %s1636_s21 = smov 18  }
  0x21   : > { %1490 = sst [smem:[#allocation10 + $0x2]] (%p1705_p5), %s1636_s21  ;;  %s1637_s28 = smov 128  }
  0x22   : > { %1491 = sst [smem:[#allocation10 + $0x3]] (%p1705_p5), %s1637_s28  ;;  %s1638_s29 = smov 8  }
  0x23   : > { %1492 = sst [smem:[#allocation10 + $0x4]] (%p1705_p5), %s1637_s28  ;;  %s146_s6 = scalar_lea.sflag [#allocation4], %s145_s4 }
  0x24   : > { %1493 = sst [smem:[#allocation10 + $0x5]] (%p1705_p5), %s1638_s29  ;;  %s1639_s7 = smov 131072  }
  0x25   : > { %s1207_s30 = sshll.u32 %s160_s12, 26 }
  0x26   : > { %s1208_s5 = sadd.s32 134217728, %s1207_s30 }
  0x27   : > { %1494 = dma.general (%p1705_p5), %s155_s11, 34560, %s169_s18, %s146_s6, %s1639_s7, [#allocation10], %s1208_s5, 0  }
  0x28 PF: > { %193 = sbr.rel (%p1726_p13) target bundleno = 218 (0xda), region = 32  ;;  %s1764_s8 = sand.u32 (!%p1726_p13), 1, %s1623_s15  }
  0x29   : > { %s1483_s9 = smul.u32 (!%p1726_p13), 2160, %s1764_s8  ;;  %s196_s10 = scalar_lea.sflag (!%p1726_p13), [#allocation4], %s1764_s8 }
  0x2b   : > { %s1768_s13 = scalar_lea.vmem (!%p1726_p13), [#allocation3], %s1483_s9 }
  0x2d   : > { %1606 = dma.done.wait (%p1711_p6), %s196_s10, 34560  }
  0x2e   : > { %1608 = vsyncadd (%p1711_p6), %s196_s10, 4294932736 }
  0x2f   : > { %1610 = dma.done.wait (%p42_p4), [#allocation6], 16  }
  0x30   : > { %1612 = vsyncadd (%p42_p4), [#allocation6], 4294967280 }
  0x31   : > { %208 = sfence }
  0x32   : > { %s247_s23 = sld [smem:[#allocation7]]  ;;  %v229_v0 = vld [vmem:[%s1768_s13] sm:$0xff]  ;;  %v230_v1 = vld [vmem:[%s1768_s13 + $0x8] sm:$0xff]  ;;  %v1211_v3 = vld [vmem:[%s1768_s13 + $0x90] sm:$0xff]  ;;  %s1484_s10 = smul.u32 144, %s1764_s8 }
  0x33   : > { %s1229_s27 = sld [smem:[#allocation7 + $0x1]]  ;;  %v1230_v4 = vld [vmem:[%s1768_s13 + $0x120] sm:$0xff]  ;;  %v1212_v5 = vld [vmem:[%s1768_s13 + $0x98] sm:$0xff]  ;;  %v1249_v7 = vld [vmem:[%s1768_s13 + $0x1b0] sm:$0xff] }
  0x34   : > { %s1248_s4 = sld [smem:[#allocation7 + $0x2]]  ;;  %v1231_v8 = vld [vmem:[%s1768_s13 + $0x128] sm:$0xff]  ;;  %v1250_v9 = vld [vmem:[%s1768_s13 + $0x1b8] sm:$0xff]  ;;  %v1268_v12 = vld [vmem:[%s1768_s13 + $0x240] sm:$0xff] }
  0x35   : > { %s1267_s24 = sld [smem:[#allocation7 + $0x3]]  ;;  %v1269_v14 = vld [vmem:[%s1768_s13 + $0x248] sm:$0xff]  ;;  %v1287_v18 = vld [vmem:[%s1768_s13 + $0x2d0] sm:$0xff]  ;;  %v1288_v20 = vld [vmem:[%s1768_s13 + $0x2d8] sm:$0xff] }
  0x36   : > { %s1286_s11 = sld [smem:[#allocation7 + $0x4]]  ;;  %v1306_v23 = vld [vmem:[%s1768_s13 + $0x360] sm:$0xff]  ;;  %v231_v26 = vld [vmem:[%s1768_s13 + $0x10] sm:$0xff]  ;;  %v1307_v37 = vld [vmem:[%s1768_s13 + $0x368] sm:$0xff] }
  0x37   : > { %s1779_s12 = sld [smem:[#allocation7 + $0x5]]  ;;  %v1213_v27 = vld [vmem:[%s1768_s13 + $0xa0] sm:$0xff]  ;;  %v1325_v30 = vld [vmem:[%s1768_s13 + $0x3f0] sm:$0xff]  ;;  %v1326_v44 = vld [vmem:[%s1768_s13 + $0x3f8] sm:$0xff] }
  0x38   : > { %v1782_v2 = vstv %s247_s23  ;;  %s1786_s18 = sld [smem:[#allocation7 + $0x6]]  ;;  %v1344_v35 = vld [vmem:[%s1768_s13 + $0x480] sm:$0xff]  ;;  %v1363_v42 = vld [vmem:[%s1768_s13 + $0x510] sm:$0xff]  ;;  %v1345_v60 = vld [vmem:[%s1768_s13 + $0x488] sm:$0xff]  ;;  %s1945_s23 = scalar_lea.vmem [#allocation8], %s1484_s10 }
  0x39   : > { %v1789_v6 = vstv %s1229_s27  ;;  %s1792_s20 = sld [smem:[#allocation7 + $0x7]]  ;;  %v249_v10 = vmul.f32 %v1782_v2, %v229_v0  ;;  %v250_v13 = vmul.f32 %v1782_v2, %v230_v1  ;;  %v1832_v32 = vmul.f32 %v1782_v2, %v231_v26  ;;  %v1382_v48 = vld [vmem:[%s1768_s13 + $0x5a0] sm:$0xff]  ;;  %v1401_v53 = vld [vmem:[%s1768_s13 + $0x630] sm:$0xff]  ;;  %s1117_s27 = sshll.u32 %s1945_s23, 4  ;;  %s2435_s27 = int_to_ptr.vmem [resolvable:$true] %s1117_s27 }
  0x3a   : > { %v1797_v11 = vstv %s1248_s4  ;;  %s1800_s21 = sld [smem:[#allocation7 + $0x8]]  ;;  %v288_v15 = vmul.f32 %v1211_v3, %v1789_v6  ;;  %v289_v19 = vmul.f32 %v1212_v5, %v1789_v6  ;;  %v1844_v38 = vmul.f32 %v1213_v27, %v1789_v6  ;;  %v1420_v58 = vld [vmem:[%s1768_s13 + $0x6c0] sm:$0xff]  ;;  %v1439_v0 = vld [vmem:[%s1768_s13 + $0x750] sm:$0xff]  ;;  %v1364_v3 = vld [vmem:[%s1768_s13 + $0x518] sm:$0xff] }
  0x3b   : > { %v327_v16 = vmul.f32 %v1230_v4, %v1797_v11  ;;  %v1806_v17 = vstv %s1267_s24  ;;  %s1809_s28 = sld [smem:[#allocation7 + $0x9]]  ;;  %v328_v24 = vmul.f32 %v1231_v8, %v1797_v11  ;;  %v1458_v8 = vld [vmem:[%s1768_s13 + $0x7e0] sm:$0xff] }
  0x3c   : > { %v366_v21 = vmul.f32 %v1249_v7, %v1806_v17  ;;  %v1814_v22 = vstv %s1286_s11  ;;  %s1817_s29 = sld [smem:[#allocation7 + $0xa]]  ;;  %v367_v25 = vmul.f32 %v1250_v9, %v1806_v17 }
  0x3d   : > { %v405_v28 = vmul.f32 %v1268_v12, %v1814_v22  ;;  %v1825_v29 = vstv %s1779_s12  ;;  %s1828_s30 = sld [smem:[#allocation7 + $0xb]]  ;;  %v406_v31 = vmul.f32 %v1269_v14, %v1814_v22  ;;  %s1104_s12 = scalar_lea.sflag [#allocation5], %s1764_s8 }
  0x3e   : > { %v462_v33 = vmul.f32 %v1287_v18, %v1825_v29  ;;  %v1836_v34 = vstv %s1786_s18  ;;  %s1839_s5 = sld [smem:[#allocation7 + $0xc]]  ;;  %v463_v36 = vmul.f32 %v1288_v20, %v1825_v29  ;;  %s1563_s18 = scalar_lea.vmem %s2435_s27, 2304 }
  0x3f   : > { %v423_v39 = vadd.f32 %v405_v28, %v249_v10  ;;  %v519_v40 = vmul.f32 %v1306_v23, %v1836_v34  ;;  %v1848_v41 = vstv %s1792_s20  ;;  %s1851_s6 = sld [smem:[#allocation7 + $0xd]]  ;;  %v424_v43 = vadd.f32 %v406_v31, %v250_v13  ;;  %v1421_v23 = vld [vmem:[%s1768_s13 + $0x6c8] sm:$0xff]  ;;  %v1232_v31 = vld [vmem:[%s1768_s13 + $0x130] sm:$0xff]  ;;  %p1564_p3 = scmp.ne.s32.totalorder %s2435_s27, %s1563_s18 }
  0x40   : > { %v480_v45 = vadd.f32 %v462_v33, %v288_v15  ;;  %v576_v46 = vmul.f32 %v1325_v30, %v1848_v41  ;;  %v1856_v47 = vstv %s1800_s21  ;;  %s1859_s7 = sld [smem:[#allocation7 + $0xe]]  ;;  %v481_v49 = vadd.f32 %v463_v36, %v289_v19  ;;  %v1383_v15 = vld [vmem:[%s1768_s13 + $0x5a8] sm:$0xff] }
  0x41   : > { %v537_v50 = vadd.f32 %v519_v40, %v327_v16  ;;  %v633_v51 = vmul.f32 %v1344_v35, %v1856_v47  ;;  %v1863_v52 = vstv %s1809_s28  ;;  %s1866_s9 = sld [smem:[#allocation2]]  ;;  %v520_v54 = vmul.f32 %v1307_v37, %v1836_v34  ;;  %v1402_v16 = vld [vmem:[%s1768_s13 + $0x638] sm:$0xff]  ;;  %p1565_p4 = pnand %p1564_p3, %p1718_p11 }
  0x42   : > { %v594_v55 = vadd.f32 %v576_v46, %v366_v21  ;;  %v690_v56 = vmul.f32 %v1363_v42, %v1863_v52  ;;  %v1871_v57 = vstv %s1817_s29  ;;  %v577_v59 = vmul.f32 %v1326_v44, %v1848_v41  ;;  %v1270_v46 = vld [vmem:[%s1768_s13 + $0x250] sm:$0xff] }
  0x43   : > { %v651_v61 = vadd.f32 %v633_v51, %v423_v39  ;;  %v747_v62 = vmul.f32 %v1382_v48, %v1871_v57  ;;  %v1878_v63 = vstv %s1828_s30  ;;  %v538_v1 = vadd.f32 %v520_v54, %v328_v24  ;;  %v1440_v24 = vld [vmem:[%s1768_s13 + $0x758] sm:$0xff]  ;;  %v1251_v39 = vld [vmem:[%s1768_s13 + $0x1c0] sm:$0xff]  ;;  %p1566_p5 = pneg %p1565_p4 }
  0x44   : > { %v708_v4 = vadd.f32 %v690_v56, %v480_v45  ;;  %v804_v5 = vmul.f32 %v1401_v53, %v1878_v63  ;;  %v1884_v7 = vstv %s1839_s5  ;;  %v595_v9 = vadd.f32 %v577_v59, %v367_v25  ;;  %v1459_v25 = vld [vmem:[%s1768_s13 + $0x7e8] sm:$0xff]  ;;  %v1289_v48 = vld [vmem:[%s1768_s13 + $0x2e0] sm:$0xff] }
  0x45   : > { %v765_v10 = vadd.f32 %v747_v62, %v537_v50  ;;  %v861_v12 = vmul.f32 %v1420_v58, %v1884_v7  ;;  %v1889_v13 = vstv %s1851_s6  ;;  %v634_v14 = vmul.f32 %v1345_v60, %v1856_v47  ;;  %v1327_v54 = vld [vmem:[%s1768_s13 + $0x400] sm:$0xff] }
  0x46   : > { %v822_v18 = vadd.f32 %v804_v5, %v594_v55  ;;  %v918_v19 = vmul.f32 %v1439_v0, %v1889_v13  ;;  %v1896_v20 = vstv %s1859_s7  ;;  %v691_v21 = vmul.f32 %v1364_v3, %v1863_v52  ;;  %v1346_v55 = vld [vmem:[%s1768_s13 + $0x490] sm:$0xff]  ;;  %v1365_v3 = vld [vmem:[%s1768_s13 + $0x520] sm:$0xff] }
  0x47   : > { %v879_v26 = vadd.f32 %v861_v12, %v651_v61  ;;  %v975_v27 = vmul.f32 %v1458_v8, %v1896_v20  ;;  %v1904_v28 = vstv %s1866_s9  ;;  %v652_v30 = vadd.f32 %v634_v14, %v424_v43  ;;  %v1308_v43 = vld [vmem:[%s1768_s13 + $0x370] sm:$0xff]  ;;  %v1403_v12 = vld [vmem:[%s1768_s13 + $0x640] sm:$0xff] }
  0x48   : > { %v936_v33 = vadd.f32 %v918_v19, %v708_v4  ;;  %v709_v35 = vadd.f32 %v691_v21, %v481_v49  ;;  %v748_v36 = vmul.f32 %v1383_v15, %v1871_v57  ;;  %v805_v37 = vmul.f32 %v1402_v16, %v1878_v63  ;;  %v1384_v4 = vld [vmem:[%s1768_s13 + $0x5b0] sm:$0xff]  ;;  %v1441_v21 = vld [vmem:[%s1768_s13 + $0x760] sm:$0xff] }
  0x49   : > { %v993_v40 = vadd.f32 %v975_v27, %v765_v10  ;;  %v862_v42 = vmul.f32 %v1421_v23, %v1884_v7  ;;  %v919_v44 = vmul.f32 %v1440_v24, %v1889_v13  ;;  %v976_v45 = vmul.f32 %v1459_v25, %v1896_v20  ;;  %v1422_v14 = vld [vmem:[%s1768_s13 + $0x6d0] sm:$0xff] }
  0x4a   : > { %v1011_v49 = vadd.f32 %v936_v33, %v879_v26  ;;  %v766_v50 = vadd.f32 %v748_v36, %v538_v1  ;;  %v823_v51 = vadd.f32 %v805_v37, %v595_v9  ;;  %v329_v53 = vmul.f32 %v1232_v31, %v1797_v11  ;;  %v1460_v23 = vld [vmem:[%s1768_s13 + $0x7f0] sm:$0xff]  ;;  %v1233_v36 = vld [vmem:[%s1768_s13 + $0x138] sm:$0xff]  ;;  %v1252_v37 = vld [vmem:[%s1768_s13 + $0x1c8] sm:$0xff] }
  0x4b   : > { %v1029_v56 = vadd.f32 %v993_v40, %v822_v18  ;;  %v880_v58 = vadd.f32 %v862_v42, %v652_v30  ;;  %v937_v59 = vadd.f32 %v919_v44, %v709_v35  ;;  %v368_v60 = vmul.f32 %v1251_v39, %v1806_v17  ;;  %v232_v30 = vld [vmem:[%s1768_s13 + $0x18] sm:$0xff]  ;;  %v1214_v35 = vld [vmem:[%s1768_s13 + $0xa8] sm:$0xff] }
  0x4c   : > { %v994_v61 = vadd.f32 %v976_v45, %v766_v50  ;;  %v407_v62 = vmul.f32 %v1270_v46, %v1814_v22  ;;  %v464_v0 = vmul.f32 %v1289_v48, %v1825_v29  ;;  %v521_v1 = vmul.f32 %v1308_v43, %v1836_v34  ;;  %v1271_v45 = vld [vmem:[%s1768_s13 + $0x258] sm:$0xff]  ;;  %v1290_v46 = vld [vmem:[%s1768_s13 + $0x2e8] sm:$0xff] }
  0x4d   : > { %v1047_v5 = vadd.f32 %v1029_v56, %v1011_v49  ;;  %v1012_v8 = vadd.f32 %v937_v59, %v880_v58  ;;  %v578_v9 = vmul.f32 %v1327_v54, %v1848_v41  ;;  %v635_v10 = vmul.f32 %v1346_v55, %v1856_v47  ;;  %v1309_v48 = vld [vmem:[%s1768_s13 + $0x378] sm:$0xff] }
  0x4e   : > { %v1030_v15 = vadd.f32 %v994_v61, %v823_v51  ;;  %v425_v16 = vadd.f32 %v407_v62, %v1832_v32  ;;  %v482_v18 = vadd.f32 %v464_v0, %v1844_v38  ;;  %v539_v19 = vadd.f32 %v521_v1, %v329_v53  ;;  %v1328_v53 = vld [vmem:[%s1768_s13 + $0x408] sm:$0xff]  ;;  %v1347_v54 = vld [vmem:[%s1768_s13 + $0x498] sm:$0xff] }
  0x4f   : > { %v1067_v24 = vadd.f32 %v1904_v28, %v1047_v5  ;;  %v596_v25 = vadd.f32 %v578_v9, %v368_v60  ;;  %v692_v26 = vmul.f32 %v1365_v3, %v1863_v52  ;;  %v749_v27 = vmul.f32 %v1384_v4, %v1871_v57  ;;  %v1366_v60 = vld [vmem:[%s1768_s13 + $0x528] sm:$0xff]  ;;  %v1385_v3 = vld [vmem:[%s1768_s13 + $0x5b8] sm:$0xff] }
  0x50   : > { %v1048_v31 = vadd.f32 %v1030_v15, %v1012_v8  ;;  %v653_v32 = vadd.f32 %v635_v10, %v425_v16  ;;  %v806_v33 = vmul.f32 %v1403_v12, %v1878_v63  ;;  %v863_v38 = vmul.f32 %v1422_v14, %v1884_v7  ;;  %v1404_v4 = vld [vmem:[%s1768_s13 + $0x648] sm:$0xff]  ;;  %v1423_v12 = vld [vmem:[%s1768_s13 + $0x6d8] sm:$0xff] }
  0x51   : > { %1085 = vst [vmem:[%s1945_s23] sm:$0xff] %v1067_v24  ;;  %v710_v39 = vadd.f32 %v692_v26, %v482_v18  ;;  %v767_v40 = vadd.f32 %v749_v27, %v539_v19  ;;  %v920_v42 = vmul.f32 %v1441_v21, %v1889_v13  ;;  %v977_v44 = vmul.f32 %v1460_v23, %v1896_v20  ;;  %v1442_v14 = vld [vmem:[%s1768_s13 + $0x768] sm:$0xff]  ;;  %v1461_v21 = vld [vmem:[%s1768_s13 + $0x7f8] sm:$0xff]  ;;  %v233_v27 = vld [vmem:[%s1768_s13 + $0x20] sm:$0xff] }
  0x52   : > { %v1068_v43 = vadd.f32 %v1904_v28, %v1048_v31  ;;  %v824_v49 = vadd.f32 %v806_v33, %v596_v25  ;;  %v881_v50 = vadd.f32 %v863_v38, %v653_v32  ;;  %v252_v51 = vmul.f32 %v1782_v2, %v232_v30  ;;  %v1215_v30 = vld [vmem:[%s1768_s13 + $0xb0] sm:$0xff] }
  0x53   : > { %v938_v55 = vadd.f32 %v920_v42, %v710_v39  ;;  %v995_v56 = vadd.f32 %v977_v44, %v767_v40  ;;  %v291_v58 = vmul.f32 %v1214_v35, %v1789_v6  ;;  %v330_v59 = vmul.f32 %v1233_v36, %v1797_v11  ;;  %v1234_v35 = vld [vmem:[%s1768_s13 + $0x140] sm:$0xff]  ;;  %v1253_v36 = vld [vmem:[%s1768_s13 + $0x1d0] sm:$0xff] }
  0x54   : > { %1086 = vst [vmem:[%s1945_s23 + $0x8] sm:$0xff] %v1068_v43  ;;  %v369_v61 = vmul.f32 %v1252_v37, %v1806_v17  ;;  %v408_v62 = vmul.f32 %v1271_v45, %v1814_v22  ;;  %v465_v0 = vmul.f32 %v1290_v46, %v1825_v29  ;;  %v522_v1 = vmul.f32 %v1309_v48, %v1836_v34  ;;  %v1272_v37 = vld [vmem:[%s1768_s13 + $0x260] sm:$0xff]  ;;  %v1291_v45 = vld [vmem:[%s1768_s13 + $0x2f0] sm:$0xff] }
  0x55   : > { %v1013_v5 = vadd.f32 %v938_v55, %v881_v50  ;;  %v1031_v8 = vadd.f32 %v995_v56, %v824_v49  ;;  %v579_v9 = vmul.f32 %v1328_v53, %v1848_v41  ;;  %v636_v10 = vmul.f32 %v1347_v54, %v1856_v47  ;;  %v1310_v46 = vld [vmem:[%s1768_s13 + $0x380] sm:$0xff]  ;;  %v1329_v48 = vld [vmem:[%s1768_s13 + $0x410] sm:$0xff] }
  0x56   : > { %v426_v15 = vadd.f32 %v408_v62, %v252_v51  ;;  %v483_v16 = vadd.f32 %v465_v0, %v291_v58  ;;  %v540_v18 = vadd.f32 %v522_v1, %v330_v59  ;;  %v693_v19 = vmul.f32 %v1366_v60, %v1863_v52  ;;  %v1348_v53 = vld [vmem:[%s1768_s13 + $0x4a0] sm:$0xff]  ;;  %v1367_v54 = vld [vmem:[%s1768_s13 + $0x530] sm:$0xff] }
  0x57   : > { %v1049_v23 = vadd.f32 %v1031_v8, %v1013_v5  ;;  %v597_v24 = vadd.f32 %v579_v9, %v369_v61  ;;  %v750_v25 = vmul.f32 %v1385_v3, %v1871_v57  ;;  %v807_v26 = vmul.f32 %v1404_v4, %v1878_v63  ;;  %v1386_v60 = vld [vmem:[%s1768_s13 + $0x5c0] sm:$0xff]  ;;  %v1405_v3 = vld [vmem:[%s1768_s13 + $0x650] sm:$0xff] }
  0x58   : > { %v654_v31 = vadd.f32 %v636_v10, %v426_v15  ;;  %v711_v32 = vadd.f32 %v693_v19, %v483_v16  ;;  %v864_v33 = vmul.f32 %v1423_v12, %v1884_v7  ;;  %v921_v38 = vmul.f32 %v1442_v14, %v1889_v13  ;;  %v1424_v4 = vld [vmem:[%s1768_s13 + $0x6e0] sm:$0xff]  ;;  %v1443_v12 = vld [vmem:[%s1768_s13 + $0x770] sm:$0xff] }
  0x59   : > { %v1069_v39 = vadd.f32 %v1904_v28, %v1049_v23  ;;  %v768_v40 = vadd.f32 %v750_v25, %v540_v18  ;;  %v825_v42 = vadd.f32 %v807_v26, %v597_v24  ;;  %v978_v44 = vmul.f32 %v1461_v21, %v1896_v20  ;;  %v1462_v14 = vld [vmem:[%s1768_s13 + $0x800] sm:$0xff]  ;;  %v234_v21 = vld [vmem:[%s1768_s13 + $0x28] sm:$0xff] }
  0x5a   : > { %v882_v43 = vadd.f32 %v864_v33, %v654_v31  ;;  %v939_v49 = vadd.f32 %v921_v38, %v711_v32  ;;  %v253_v50 = vmul.f32 %v1782_v2, %v233_v27  ;;  %v292_v51 = vmul.f32 %v1215_v30, %v1789_v6  ;;  %v1216_v27 = vld [vmem:[%s1768_s13 + $0xb8] sm:$0xff]  ;;  %v1235_v30 = vld [vmem:[%s1768_s13 + $0x148] sm:$0xff] }
  0x5b   : > { %1087 = vst [vmem:[%s1945_s23 + $0x10] sm:$0xff] %v1069_v39  ;;  %v996_v55 = vadd.f32 %v978_v44, %v768_v40  ;;  %v331_v56 = vmul.f32 %v1234_v35, %v1797_v11  ;;  %v370_v58 = vmul.f32 %v1253_v36, %v1806_v17  ;;  %v409_v59 = vmul.f32 %v1272_v37, %v1814_v22  ;;  %v1254_v31 = vld [vmem:[%s1768_s13 + $0x1d8] sm:$0xff]  ;;  %v1273_v36 = vld [vmem:[%s1768_s13 + $0x268] sm:$0xff] }
  0x5c   : > { %v1014_v61 = vadd.f32 %v939_v49, %v882_v43  ;;  %v466_v62 = vmul.f32 %v1291_v45, %v1825_v29  ;;  %v523_v0 = vmul.f32 %v1310_v46, %v1836_v34  ;;  %v580_v1 = vmul.f32 %v1329_v48, %v1848_v41  ;;  %v1292_v37 = vld [vmem:[%s1768_s13 + $0x2f8] sm:$0xff]  ;;  %v1311_v39 = vld [vmem:[%s1768_s13 + $0x388] sm:$0xff] }
  0x5d   : > { %v1032_v5 = vadd.f32 %v996_v55, %v825_v42  ;;  %v427_v8 = vadd.f32 %v409_v59, %v253_v50  ;;  %v637_v9 = vmul.f32 %v1348_v53, %v1856_v47  ;;  %v694_v10 = vmul.f32 %v1367_v54, %v1863_v52  ;;  %v1330_v46 = vld [vmem:[%s1768_s13 + $0x418] sm:$0xff]  ;;  %v1349_v48 = vld [vmem:[%s1768_s13 + $0x4a8] sm:$0xff] }
  0x5e   : > { %v484_v15 = vadd.f32 %v466_v62, %v292_v51  ;;  %v541_v16 = vadd.f32 %v523_v0, %v331_v56  ;;  %v598_v18 = vadd.f32 %v580_v1, %v370_v58  ;;  %v751_v19 = vmul.f32 %v1386_v60, %v1871_v57  ;;  %v1368_v53 = vld [vmem:[%s1768_s13 + $0x538] sm:$0xff]  ;;  %v1387_v59 = vld [vmem:[%s1768_s13 + $0x5c8] sm:$0xff] }
  0x5f   : > { %v1050_v23 = vadd.f32 %v1032_v5, %v1014_v61  ;;  %v655_v24 = vadd.f32 %v637_v9, %v427_v8  ;;  %v808_v25 = vmul.f32 %v1405_v3, %v1878_v63  ;;  %v865_v26 = vmul.f32 %v1424_v4, %v1884_v7  ;;  %v1406_v60 = vld [vmem:[%s1768_s13 + $0x658] sm:$0xff]  ;;  %v1425_v3 = vld [vmem:[%s1768_s13 + $0x6e8] sm:$0xff] }
  0x60   : > { %v712_v32 = vadd.f32 %v694_v10, %v484_v15  ;;  %v769_v33 = vadd.f32 %v751_v19, %v541_v16  ;;  %v922_v38 = vmul.f32 %v1443_v12, %v1889_v13  ;;  %v979_v35 = vmul.f32 %v1462_v14, %v1896_v20  ;;  %v1444_v4 = vld [vmem:[%s1768_s13 + $0x778] sm:$0xff]  ;;  %v1463_v12 = vld [vmem:[%s1768_s13 + $0x808] sm:$0xff]  ;;  %v235_v19 = vld [vmem:[%s1768_s13 + $0x30] sm:$0xff] }
  0x61   : > { %v1070_v40 = vadd.f32 %v1904_v28, %v1050_v23  ;;  %v826_v42 = vadd.f32 %v808_v25, %v598_v18  ;;  %v883_v44 = vadd.f32 %v865_v26, %v655_v24  ;;  %v254_v45 = vmul.f32 %v1782_v2, %v234_v21  ;;  %v1217_v21 = vld [vmem:[%s1768_s13 + $0xc0] sm:$0xff] }
  0x62   : > { %v940_v43 = vadd.f32 %v922_v38, %v712_v32  ;;  %v997_v49 = vadd.f32 %v979_v35, %v769_v33  ;;  %v293_v50 = vmul.f32 %v1216_v27, %v1789_v6  ;;  %v332_v51 = vmul.f32 %v1235_v30, %v1797_v11  ;;  %v1236_v27 = vld [vmem:[%s1768_s13 + $0x150] sm:$0xff]  ;;  %v1255_v30 = vld [vmem:[%s1768_s13 + $0x1e0] sm:$0xff] }
  0x63   : > { %1088 = vst [vmem:[%s1945_s23 + $0x18] sm:$0xff] %v1070_v40  ;;  %v371_v54 = vmul.f32 %v1254_v31, %v1806_v17  ;;  %v410_v55 = vmul.f32 %v1273_v36, %v1814_v22  ;;  %v467_v56 = vmul.f32 %v1292_v37, %v1825_v29  ;;  %v524_v58 = vmul.f32 %v1311_v39, %v1836_v34  ;;  %v1274_v31 = vld [vmem:[%s1768_s13 + $0x270] sm:$0xff]  ;;  %v1293_v36 = vld [vmem:[%s1768_s13 + $0x300] sm:$0xff] }
  0x64   : > { %v1015_v61 = vadd.f32 %v940_v43, %v883_v44  ;;  %v1033_v62 = vadd.f32 %v997_v49, %v826_v42  ;;  %v581_v0 = vmul.f32 %v1330_v46, %v1848_v41  ;;  %v638_v1 = vmul.f32 %v1349_v48, %v1856_v47  ;;  %v1312_v37 = vld [vmem:[%s1768_s13 + $0x390] sm:$0xff]  ;;  %v1331_v39 = vld [vmem:[%s1768_s13 + $0x420] sm:$0xff] }
  0x65   : > { %v428_v5 = vadd.f32 %v410_v55, %v254_v45  ;;  %v485_v8 = vadd.f32 %v467_v56, %v293_v50  ;;  %v542_v9 = vadd.f32 %v524_v58, %v332_v51  ;;  %v695_v10 = vmul.f32 %v1368_v53, %v1863_v52  ;;  %v1350_v46 = vld [vmem:[%s1768_s13 + $0x4b0] sm:$0xff]  ;;  %v1369_v48 = vld [vmem:[%s1768_s13 + $0x540] sm:$0xff] }
  0x66   : > { %v1051_v14 = vadd.f32 %v1033_v62, %v1015_v61  ;;  %v599_v15 = vadd.f32 %v581_v0, %v371_v54  ;;  %v752_v16 = vmul.f32 %v1387_v59, %v1871_v57  ;;  %v809_v18 = vmul.f32 %v1406_v60, %v1878_v63  ;;  %v1388_v53 = vld [vmem:[%s1768_s13 + $0x5d0] sm:$0xff]  ;;  %v1407_v59 = vld [vmem:[%s1768_s13 + $0x660] sm:$0xff] }
  0x67   : > { %v656_v23 = vadd.f32 %v638_v1, %v428_v5  ;;  %v713_v24 = vadd.f32 %v695_v10, %v485_v8  ;;  %v866_v25 = vmul.f32 %v1425_v3, %v1884_v7  ;;  %v923_v26 = vmul.f32 %v1444_v4, %v1889_v13  ;;  %v1426_v60 = vld [vmem:[%s1768_s13 + $0x6f0] sm:$0xff]  ;;  %v1445_v3 = vld [vmem:[%s1768_s13 + $0x780] sm:$0xff] }
  0x68   : > { %v1071_v32 = vadd.f32 %v1904_v28, %v1051_v14  ;;  %v770_v33 = vadd.f32 %v752_v16, %v542_v9  ;;  %v827_v38 = vadd.f32 %v809_v18, %v599_v15  ;;  %v980_v35 = vmul.f32 %v1463_v12, %v1896_v20  ;;  %v1464_v4 = vld [vmem:[%s1768_s13 + $0x810] sm:$0xff]  ;;  %v236_v12 = vld [vmem:[%s1768_s13 + $0x38] sm:$0xff] }
  0x69   : > { %v884_v40 = vadd.f32 %v866_v25, %v656_v23  ;;  %v941_v42 = vadd.f32 %v923_v26, %v713_v24  ;;  %v255_v44 = vmul.f32 %v1782_v2, %v235_v19  ;;  %v294_v45 = vmul.f32 %v1217_v21, %v1789_v6  ;;  %v1218_v19 = vld [vmem:[%s1768_s13 + $0xc8] sm:$0xff]  ;;  %v1237_v21 = vld [vmem:[%s1768_s13 + $0x158] sm:$0xff] }
  0x6a   : > { %1089 = vst [vmem:[%s1945_s23 + $0x20] sm:$0xff] %v1071_v32  ;;  %v998_v43 = vadd.f32 %v980_v35, %v770_v33  ;;  %v333_v49 = vmul.f32 %v1236_v27, %v1797_v11  ;;  %v372_v50 = vmul.f32 %v1255_v30, %v1806_v17  ;;  %v411_v51 = vmul.f32 %v1274_v31, %v1814_v22  ;;  %v1256_v23 = vld [vmem:[%s1768_s13 + $0x1e8] sm:$0xff]  ;;  %v1275_v30 = vld [vmem:[%s1768_s13 + $0x278] sm:$0xff] }
  0x6b   : > { %v1016_v54 = vadd.f32 %v941_v42, %v884_v40  ;;  %v468_v55 = vmul.f32 %v1293_v36, %v1825_v29  ;;  %v525_v56 = vmul.f32 %v1312_v37, %v1836_v34  ;;  %v582_v58 = vmul.f32 %v1331_v39, %v1848_v41  ;;  %v1294_v31 = vld [vmem:[%s1768_s13 + $0x308] sm:$0xff]  ;;  %v1313_v32 = vld [vmem:[%s1768_s13 + $0x398] sm:$0xff] }
  0x6c   : > { %v1034_v61 = vadd.f32 %v998_v43, %v827_v38  ;;  %v429_v62 = vadd.f32 %v411_v51, %v255_v44  ;;  %v639_v0 = vmul.f32 %v1350_v46, %v1856_v47  ;;  %v696_v1 = vmul.f32 %v1369_v48, %v1863_v52  ;;  %v1332_v37 = vld [vmem:[%s1768_s13 + $0x428] sm:$0xff]  ;;  %v1351_v39 = vld [vmem:[%s1768_s13 + $0x4b8] sm:$0xff] }
  0x6d   : > { %v486_v5 = vadd.f32 %v468_v55, %v294_v45  ;;  %v543_v8 = vadd.f32 %v525_v56, %v333_v49  ;;  %v600_v9 = vadd.f32 %v582_v58, %v372_v50  ;;  %v753_v10 = vmul.f32 %v1388_v53, %v1871_v57  ;;  %v1370_v46 = vld [vmem:[%s1768_s13 + $0x548] sm:$0xff]  ;;  %v1389_v51 = vld [vmem:[%s1768_s13 + $0x5d8] sm:$0xff] }
  0x6e   : > { %v1052_v14 = vadd.f32 %v1034_v61, %v1016_v54  ;;  %v657_v15 = vadd.f32 %v639_v0, %v429_v62  ;;  %v810_v16 = vmul.f32 %v1407_v59, %v1878_v63  ;;  %v867_v18 = vmul.f32 %v1426_v60, %v1884_v7  ;;  %v1408_v53 = vld [vmem:[%s1768_s13 + $0x668] sm:$0xff]  ;;  %v1427_v59 = vld [vmem:[%s1768_s13 + $0x6f8] sm:$0xff] }
  0x6f   : > { %v714_v24 = vadd.f32 %v696_v1, %v486_v5  ;;  %v771_v25 = vadd.f32 %v753_v10, %v543_v8  ;;  %v924_v26 = vmul.f32 %v1445_v3, %v1889_v13  ;;  %v981_v27 = vmul.f32 %v1464_v4, %v1896_v20  ;;  %v1446_v60 = vld [vmem:[%s1768_s13 + $0x788] sm:$0xff]  ;;  %v1465_v3 = vld [vmem:[%s1768_s13 + $0x818] sm:$0xff]  ;;  %v237_v10 = vld [vmem:[%s1768_s13 + $0x40] sm:$0xff] }
  0x70   : > { %v1072_v33 = vadd.f32 %v1904_v28, %v1052_v14  ;;  %v828_v38 = vadd.f32 %v810_v16, %v600_v9  ;;  %v885_v35 = vadd.f32 %v867_v18, %v657_v15  ;;  %v256_v36 = vmul.f32 %v1782_v2, %v236_v12  ;;  %v1219_v12 = vld [vmem:[%s1768_s13 + $0xd0] sm:$0xff] }
  0x71   : > { %v942_v40 = vadd.f32 %v924_v26, %v714_v24  ;;  %v999_v42 = vadd.f32 %v981_v27, %v771_v25  ;;  %v295_v44 = vmul.f32 %v1218_v19, %v1789_v6  ;;  %v334_v45 = vmul.f32 %v1237_v21, %v1797_v11  ;;  %v1238_v19 = vld [vmem:[%s1768_s13 + $0x160] sm:$0xff]  ;;  %v1257_v21 = vld [vmem:[%s1768_s13 + $0x1f0] sm:$0xff] }
  0x72   : > { %1090 = vst [vmem:[%s1945_s23 + $0x28] sm:$0xff] %v1072_v33  ;;  %v373_v48 = vmul.f32 %v1256_v23, %v1806_v17  ;;  %v412_v43 = vmul.f32 %v1275_v30, %v1814_v22  ;;  %v469_v49 = vmul.f32 %v1294_v31, %v1825_v29  ;;  %v526_v50 = vmul.f32 %v1313_v32, %v1836_v34  ;;  %v1276_v23 = vld [vmem:[%s1768_s13 + $0x280] sm:$0xff]  ;;  %v1295_v30 = vld [vmem:[%s1768_s13 + $0x310] sm:$0xff] }
  0x73   : > { %v1017_v54 = vadd.f32 %v942_v40, %v885_v35  ;;  %v1035_v55 = vadd.f32 %v999_v42, %v828_v38  ;;  %v583_v56 = vmul.f32 %v1332_v37, %v1848_v41  ;;  %v640_v58 = vmul.f32 %v1351_v39, %v1856_v47  ;;  %v1314_v31 = vld [vmem:[%s1768_s13 + $0x3a0] sm:$0xff]  ;;  %v1333_v32 = vld [vmem:[%s1768_s13 + $0x430] sm:$0xff] }
  0x74   : > { %v430_v61 = vadd.f32 %v412_v43, %v256_v36  ;;  %v487_v62 = vadd.f32 %v469_v49, %v295_v44  ;;  %v544_v0 = vadd.f32 %v526_v50, %v334_v45  ;;  %v697_v1 = vmul.f32 %v1370_v46, %v1863_v52  ;;  %v1352_v37 = vld [vmem:[%s1768_s13 + $0x4c0] sm:$0xff]  ;;  %v1371_v39 = vld [vmem:[%s1768_s13 + $0x550] sm:$0xff] }
  0x75   : > { %v1053_v4 = vadd.f32 %v1035_v55, %v1017_v54  ;;  %v601_v5 = vadd.f32 %v583_v56, %v373_v48  ;;  %v754_v8 = vmul.f32 %v1389_v51, %v1871_v57  ;;  %v811_v9 = vmul.f32 %v1408_v53, %v1878_v63  ;;  %v1390_v46 = vld [vmem:[%s1768_s13 + $0x5e0] sm:$0xff]  ;;  %v1409_v51 = vld [vmem:[%s1768_s13 + $0x670] sm:$0xff] }
  0x76   : > { %v658_v14 = vadd.f32 %v640_v58, %v430_v61  ;;  %v715_v15 = vadd.f32 %v697_v1, %v487_v62  ;;  %v868_v16 = vmul.f32 %v1427_v59, %v1884_v7  ;;  %v925_v18 = vmul.f32 %v1446_v60, %v1889_v13  ;;  %v1428_v53 = vld [vmem:[%s1768_s13 + $0x700] sm:$0xff]  ;;  %v1447_v59 = vld [vmem:[%s1768_s13 + $0x790] sm:$0xff] }
  0x77   : > { %v1073_v24 = vadd.f32 %v1904_v28, %v1053_v4  ;;  %v772_v25 = vadd.f32 %v754_v8, %v544_v0  ;;  %v829_v26 = vadd.f32 %v811_v9, %v601_v5  ;;  %v982_v27 = vmul.f32 %v1465_v3, %v1896_v20  ;;  %v1466_v60 = vld [vmem:[%s1768_s13 + $0x820] sm:$0xff]  ;;  %v238_v3 = vld [vmem:[%s1768_s13 + $0x48] sm:$0xff] }
  0x78   : > { %v886_v33 = vadd.f32 %v868_v16, %v658_v14  ;;  %v943_v38 = vadd.f32 %v925_v18, %v715_v15  ;;  %v257_v35 = vmul.f32 %v1782_v2, %v237_v10  ;;  %v296_v36 = vmul.f32 %v1219_v12, %v1789_v6  ;;  %v1220_v10 = vld [vmem:[%s1768_s13 + $0xd8] sm:$0xff]  ;;  %v1239_v12 = vld [vmem:[%s1768_s13 + $0x168] sm:$0xff] }
  0x79   : > { %1091 = vst [vmem:[%s1945_s23 + $0x30] sm:$0xff] %v1073_v24  ;;  %v1000_v40 = vadd.f32 %v982_v27, %v772_v25  ;;  %v335_v42 = vmul.f32 %v1238_v19, %v1797_v11  ;;  %v374_v44 = vmul.f32 %v1257_v21, %v1806_v17  ;;  %v413_v45 = vmul.f32 %v1276_v23, %v1814_v22  ;;  %v1258_v14 = vld [vmem:[%s1768_s13 + $0x1f8] sm:$0xff]  ;;  %v1277_v21 = vld [vmem:[%s1768_s13 + $0x288] sm:$0xff] }
  0x7a   : > { %v1018_v48 = vadd.f32 %v943_v38, %v886_v33  ;;  %v470_v43 = vmul.f32 %v1295_v30, %v1825_v29  ;;  %v527_v49 = vmul.f32 %v1314_v31, %v1836_v34  ;;  %v584_v50 = vmul.f32 %v1333_v32, %v1848_v41  ;;  %v1296_v23 = vld [vmem:[%s1768_s13 + $0x318] sm:$0xff]  ;;  %v1315_v24 = vld [vmem:[%s1768_s13 + $0x3a8] sm:$0xff] }
  0x7b   : > { %v1036_v54 = vadd.f32 %v1000_v40, %v829_v26  ;;  %v431_v55 = vadd.f32 %v413_v45, %v257_v35  ;;  %v641_v56 = vmul.f32 %v1352_v37, %v1856_v47  ;;  %v698_v58 = vmul.f32 %v1371_v39, %v1863_v52  ;;  %v1334_v31 = vld [vmem:[%s1768_s13 + $0x438] sm:$0xff]  ;;  %v1353_v32 = vld [vmem:[%s1768_s13 + $0x4c8] sm:$0xff] }
  0x7c   : > { %v488_v61 = vadd.f32 %v470_v43, %v296_v36  ;;  %v545_v62 = vadd.f32 %v527_v49, %v335_v42  ;;  %v602_v0 = vadd.f32 %v584_v50, %v374_v44  ;;  %v755_v1 = vmul.f32 %v1390_v46, %v1871_v57  ;;  %v1372_v37 = vld [vmem:[%s1768_s13 + $0x558] sm:$0xff]  ;;  %v1391_v45 = vld [vmem:[%s1768_s13 + $0x5e8] sm:$0xff] }
  0x7d   : > { %v1054_v4 = vadd.f32 %v1036_v54, %v1018_v48  ;;  %v659_v5 = vadd.f32 %v641_v56, %v431_v55  ;;  %v812_v8 = vmul.f32 %v1409_v51, %v1878_v63  ;;  %v869_v9 = vmul.f32 %v1428_v53, %v1884_v7  ;;  %v1410_v46 = vld [vmem:[%s1768_s13 + $0x678] sm:$0xff]  ;;  %v1429_v51 = vld [vmem:[%s1768_s13 + $0x708] sm:$0xff] }
  0x7e   : > { %v716_v15 = vadd.f32 %v698_v58, %v488_v61  ;;  %v773_v16 = vadd.f32 %v755_v1, %v545_v62  ;;  %v926_v18 = vmul.f32 %v1447_v59, %v1889_v13  ;;  %v983_v19 = vmul.f32 %v1466_v60, %v1896_v20  ;;  %v1448_v53 = vld [vmem:[%s1768_s13 + $0x798] sm:$0xff]  ;;  %v1467_v59 = vld [vmem:[%s1768_s13 + $0x828] sm:$0xff]  ;;  %v239_v1 = vld [vmem:[%s1768_s13 + $0x50] sm:$0xff] }
  0x7f   : > { %v1074_v25 = vadd.f32 %v1904_v28, %v1054_v4  ;;  %v830_v26 = vadd.f32 %v812_v8, %v602_v0  ;;  %v887_v27 = vadd.f32 %v869_v9, %v659_v5  ;;  %v258_v30 = vmul.f32 %v1782_v2, %v238_v3  ;;  %v1221_v3 = vld [vmem:[%s1768_s13 + $0xe0] sm:$0xff] }
  0x80   : > { %v944_v33 = vadd.f32 %v926_v18, %v716_v15  ;;  %v1001_v38 = vadd.f32 %v983_v19, %v773_v16  ;;  %v297_v35 = vmul.f32 %v1220_v10, %v1789_v6  ;;  %v336_v36 = vmul.f32 %v1239_v12, %v1797_v11  ;;  %v1240_v10 = vld [vmem:[%s1768_s13 + $0x170] sm:$0xff]  ;;  %v1259_v12 = vld [vmem:[%s1768_s13 + $0x200] sm:$0xff] }
  0x81   : > { %1092 = vst [vmem:[%s1945_s23 + $0x38] sm:$0xff] %v1074_v25  ;;  %v375_v39 = vmul.f32 %v1258_v14, %v1806_v17  ;;  %v414_v40 = vmul.f32 %v1277_v21, %v1814_v22  ;;  %v471_v42 = vmul.f32 %v1296_v23, %v1825_v29  ;;  %v528_v44 = vmul.f32 %v1315_v24, %v1836_v34  ;;  %v1278_v14 = vld [vmem:[%s1768_s13 + $0x290] sm:$0xff]  ;;  %v1297_v21 = vld [vmem:[%s1768_s13 + $0x320] sm:$0xff] }
  0x82   : > { %v1019_v48 = vadd.f32 %v944_v33, %v887_v27  ;;  %v1037_v43 = vadd.f32 %v1001_v38, %v830_v26  ;;  %v585_v49 = vmul.f32 %v1334_v31, %v1848_v41  ;;  %v642_v50 = vmul.f32 %v1353_v32, %v1856_v47  ;;  %v1316_v23 = vld [vmem:[%s1768_s13 + $0x3b0] sm:$0xff]  ;;  %v1335_v24 = vld [vmem:[%s1768_s13 + $0x440] sm:$0xff] }
  0x83   : > { %v432_v54 = vadd.f32 %v414_v40, %v258_v30  ;;  %v489_v55 = vadd.f32 %v471_v42, %v297_v35  ;;  %v546_v56 = vadd.f32 %v528_v44, %v336_v36  ;;  %v699_v58 = vmul.f32 %v1372_v37, %v1863_v52  ;;  %v1354_v31 = vld [vmem:[%s1768_s13 + $0x4d0] sm:$0xff]  ;;  %v1373_v32 = vld [vmem:[%s1768_s13 + $0x560] sm:$0xff] }
  0x84   : > { %v1055_v60 = vadd.f32 %v1037_v43, %v1019_v48  ;;  %v603_v61 = vadd.f32 %v585_v49, %v375_v39  ;;  %v756_v62 = vmul.f32 %v1391_v45, %v1871_v57  ;;  %v813_v0 = vmul.f32 %v1410_v46, %v1878_v63  ;;  %v1392_v37 = vld [vmem:[%s1768_s13 + $0x5f0] sm:$0xff]  ;;  %v1411_v45 = vld [vmem:[%s1768_s13 + $0x680] sm:$0xff] }
  0x85   : > { %v660_v4 = vadd.f32 %v642_v50, %v432_v54  ;;  %v717_v5 = vadd.f32 %v699_v58, %v489_v55  ;;  %v870_v8 = vmul.f32 %v1429_v51, %v1884_v7  ;;  %v927_v9 = vmul.f32 %v1448_v53, %v1889_v13  ;;  %v1430_v46 = vld [vmem:[%s1768_s13 + $0x710] sm:$0xff]  ;;  %v1449_v51 = vld [vmem:[%s1768_s13 + $0x7a0] sm:$0xff] }
  0x86   : > { %v1075_v15 = vadd.f32 %v1904_v28, %v1055_v60  ;;  %v774_v16 = vadd.f32 %v756_v62, %v546_v56  ;;  %v831_v18 = vadd.f32 %v813_v0, %v603_v61  ;;  %v984_v19 = vmul.f32 %v1467_v59, %v1896_v20  ;;  %v1468_v53 = vld [vmem:[%s1768_s13 + $0x830] sm:$0xff]  ;;  %v240_v59 = vld [vmem:[%s1768_s13 + $0x58] sm:$0xff] }
  0x87   : > { %v888_v25 = vadd.f32 %v870_v8, %v660_v4  ;;  %v945_v26 = vadd.f32 %v927_v9, %v717_v5  ;;  %v259_v27 = vmul.f32 %v1782_v2, %v239_v1  ;;  %v298_v30 = vmul.f32 %v1221_v3, %v1789_v6  ;;  %v1222_v1 = vld [vmem:[%s1768_s13 + $0xe8] sm:$0xff]  ;;  %v1241_v3 = vld [vmem:[%s1768_s13 + $0x178] sm:$0xff] }
  0x88   : > { %1093 = vst [vmem:[%s1945_s23 + $0x40] sm:$0xff] %v1075_v15  ;;  %v1002_v33 = vadd.f32 %v984_v19, %v774_v16  ;;  %v337_v38 = vmul.f32 %v1240_v10, %v1797_v11  ;;  %v376_v35 = vmul.f32 %v1259_v12, %v1806_v17  ;;  %v415_v36 = vmul.f32 %v1278_v14, %v1814_v22  ;;  %v1260_v4 = vld [vmem:[%s1768_s13 + $0x208] sm:$0xff]  ;;  %v1279_v12 = vld [vmem:[%s1768_s13 + $0x298] sm:$0xff] }
  0x89   : > { %v1020_v39 = vadd.f32 %v945_v26, %v888_v25  ;;  %v472_v40 = vmul.f32 %v1297_v21, %v1825_v29  ;;  %v529_v42 = vmul.f32 %v1316_v23, %v1836_v34  ;;  %v586_v44 = vmul.f32 %v1335_v24, %v1848_v41  ;;  %v1298_v14 = vld [vmem:[%s1768_s13 + $0x328] sm:$0xff]  ;;  %v1317_v15 = vld [vmem:[%s1768_s13 + $0x3b8] sm:$0xff] }
  0x8a   : > { %v1038_v48 = vadd.f32 %v1002_v33, %v831_v18  ;;  %v433_v43 = vadd.f32 %v415_v36, %v259_v27  ;;  %v643_v49 = vmul.f32 %v1354_v31, %v1856_v47  ;;  %v700_v50 = vmul.f32 %v1373_v32, %v1863_v52  ;;  %v1336_v23 = vld [vmem:[%s1768_s13 + $0x448] sm:$0xff]  ;;  %v1355_v24 = vld [vmem:[%s1768_s13 + $0x4d8] sm:$0xff] }
  0x8b   : > { %v490_v54 = vadd.f32 %v472_v40, %v298_v30  ;;  %v547_v55 = vadd.f32 %v529_v42, %v337_v38  ;;  %v604_v56 = vadd.f32 %v586_v44, %v376_v35  ;;  %v757_v58 = vmul.f32 %v1392_v37, %v1871_v57  ;;  %v1374_v31 = vld [vmem:[%s1768_s13 + $0x568] sm:$0xff]  ;;  %v1393_v36 = vld [vmem:[%s1768_s13 + $0x5f8] sm:$0xff] }
  0x8c   : > { %v1056_v60 = vadd.f32 %v1038_v48, %v1020_v39  ;;  %v661_v61 = vadd.f32 %v643_v49, %v433_v43  ;;  %v814_v62 = vmul.f32 %v1411_v45, %v1878_v63  ;;  %v871_v0 = vmul.f32 %v1430_v46, %v1884_v7  ;;  %v1412_v37 = vld [vmem:[%s1768_s13 + $0x688] sm:$0xff]  ;;  %v1431_v45 = vld [vmem:[%s1768_s13 + $0x718] sm:$0xff] }
  0x8d   : > { %v718_v5 = vadd.f32 %v700_v50, %v490_v54  ;;  %v775_v8 = vadd.f32 %v757_v58, %v547_v55  ;;  %v928_v9 = vmul.f32 %v1449_v51, %v1889_v13  ;;  %v985_v10 = vmul.f32 %v1468_v53, %v1896_v20  ;;  %v1450_v46 = vld [vmem:[%s1768_s13 + $0x7a8] sm:$0xff]  ;;  %v1469_v51 = vld [vmem:[%s1768_s13 + $0x838] sm:$0xff]  ;;  %v241_v58 = vld [vmem:[%s1768_s13 + $0x60] sm:$0xff] }
  0x8e   : > { %v1076_v16 = vadd.f32 %v1904_v28, %v1056_v60  ;;  %v832_v18 = vadd.f32 %v814_v62, %v604_v56  ;;  %v889_v19 = vadd.f32 %v871_v0, %v661_v61  ;;  %v260_v21 = vmul.f32 %v1782_v2, %v240_v59  ;;  %v1223_v59 = vld [vmem:[%s1768_s13 + $0xf0] sm:$0xff] }
  0x8f   : > { %v946_v25 = vadd.f32 %v928_v9, %v718_v5  ;;  %v1003_v26 = vadd.f32 %v985_v10, %v775_v8  ;;  %v299_v27 = vmul.f32 %v1222_v1, %v1789_v6  ;;  %v338_v30 = vmul.f32 %v1241_v3, %v1797_v11  ;;  %v1242_v1 = vld [vmem:[%s1768_s13 + $0x180] sm:$0xff]  ;;  %v1261_v3 = vld [vmem:[%s1768_s13 + $0x210] sm:$0xff] }
  0x90   : > { %1094 = vst [vmem:[%s1945_s23 + $0x48] sm:$0xff] %v1076_v16  ;;  %v377_v32 = vmul.f32 %v1260_v4, %v1806_v17  ;;  %v416_v33 = vmul.f32 %v1279_v12, %v1814_v22  ;;  %v473_v38 = vmul.f32 %v1298_v14, %v1825_v29  ;;  %v530_v35 = vmul.f32 %v1317_v15, %v1836_v34  ;;  %v1280_v4 = vld [vmem:[%s1768_s13 + $0x2a0] sm:$0xff]  ;;  %v1299_v12 = vld [vmem:[%s1768_s13 + $0x330] sm:$0xff] }
  0x91   : > { %v1021_v39 = vadd.f32 %v946_v25, %v889_v19  ;;  %v1039_v40 = vadd.f32 %v1003_v26, %v832_v18  ;;  %v587_v42 = vmul.f32 %v1336_v23, %v1848_v41  ;;  %v644_v44 = vmul.f32 %v1355_v24, %v1856_v47  ;;  %v1318_v14 = vld [vmem:[%s1768_s13 + $0x3c0] sm:$0xff]  ;;  %v1337_v15 = vld [vmem:[%s1768_s13 + $0x450] sm:$0xff] }
  0x92   : > { %v434_v48 = vadd.f32 %v416_v33, %v260_v21  ;;  %v491_v43 = vadd.f32 %v473_v38, %v299_v27  ;;  %v548_v49 = vadd.f32 %v530_v35, %v338_v30  ;;  %v701_v50 = vmul.f32 %v1374_v31, %v1863_v52  ;;  %v1356_v23 = vld [vmem:[%s1768_s13 + $0x4e0] sm:$0xff]  ;;  %v1375_v24 = vld [vmem:[%s1768_s13 + $0x570] sm:$0xff] }
  0x93   : > { %v1057_v53 = vadd.f32 %v1039_v40, %v1021_v39  ;;  %v605_v54 = vadd.f32 %v587_v42, %v377_v32  ;;  %v758_v55 = vmul.f32 %v1393_v36, %v1871_v57  ;;  %v815_v56 = vmul.f32 %v1412_v37, %v1878_v63  ;;  %v1394_v31 = vld [vmem:[%s1768_s13 + $0x600] sm:$0xff]  ;;  %v1413_v36 = vld [vmem:[%s1768_s13 + $0x690] sm:$0xff] }
  0x94   : > { %v662_v60 = vadd.f32 %v644_v44, %v434_v48  ;;  %v719_v61 = vadd.f32 %v701_v50, %v491_v43  ;;  %v872_v62 = vmul.f32 %v1431_v45, %v1884_v7  ;;  %v929_v0 = vmul.f32 %v1450_v46, %v1889_v13  ;;  %v1432_v37 = vld [vmem:[%s1768_s13 + $0x720] sm:$0xff]  ;;  %v1451_v45 = vld [vmem:[%s1768_s13 + $0x7b0] sm:$0xff] }
  0x95   : > { %v1077_v5 = vadd.f32 %v1904_v28, %v1057_v53  ;;  %v776_v8 = vadd.f32 %v758_v55, %v548_v49  ;;  %v833_v9 = vadd.f32 %v815_v56, %v605_v54  ;;  %v986_v10 = vmul.f32 %v1469_v51, %v1896_v20  ;;  %v1470_v46 = vld [vmem:[%s1768_s13 + $0x840] sm:$0xff]  ;;  %v242_v51 = vld [vmem:[%s1768_s13 + $0x68] sm:$0xff] }
  0x96   : > { %v890_v16 = vadd.f32 %v872_v62, %v662_v60  ;;  %v947_v18 = vadd.f32 %v929_v0, %v719_v61  ;;  %v261_v19 = vmul.f32 %v1782_v2, %v241_v58  ;;  %v300_v21 = vmul.f32 %v1223_v59, %v1789_v6  ;;  %v1224_v58 = vld [vmem:[%s1768_s13 + $0xf8] sm:$0xff]  ;;  %v1243_v59 = vld [vmem:[%s1768_s13 + $0x188] sm:$0xff] }
  0x97   : > { %1095 = vst [vmem:[%s1945_s23 + $0x50] sm:$0xff] %v1077_v5  ;;  %v1004_v25 = vadd.f32 %v986_v10, %v776_v8  ;;  %v339_v26 = vmul.f32 %v1242_v1, %v1797_v11  ;;  %v378_v27 = vmul.f32 %v1261_v3, %v1806_v17  ;;  %v417_v30 = vmul.f32 %v1280_v4, %v1814_v22  ;;  %v1262_v60 = vld [vmem:[%s1768_s13 + $0x218] sm:$0xff]  ;;  %v1281_v3 = vld [vmem:[%s1768_s13 + $0x2a8] sm:$0xff] }
  0x98   : > { %v1022_v32 = vadd.f32 %v947_v18, %v890_v16  ;;  %v474_v33 = vmul.f32 %v1299_v12, %v1825_v29  ;;  %v531_v38 = vmul.f32 %v1318_v14, %v1836_v34  ;;  %v588_v35 = vmul.f32 %v1337_v15, %v1848_v41  ;;  %v1300_v4 = vld [vmem:[%s1768_s13 + $0x338] sm:$0xff]  ;;  %v1319_v5 = vld [vmem:[%s1768_s13 + $0x3c8] sm:$0xff] }
  0x99   : > { %v1040_v39 = vadd.f32 %v1004_v25, %v833_v9  ;;  %v435_v40 = vadd.f32 %v417_v30, %v261_v19  ;;  %v645_v42 = vmul.f32 %v1356_v23, %v1856_v47  ;;  %v702_v44 = vmul.f32 %v1375_v24, %v1863_v52  ;;  %v1338_v14 = vld [vmem:[%s1768_s13 + $0x458] sm:$0xff]  ;;  %v1357_v15 = vld [vmem:[%s1768_s13 + $0x4e8] sm:$0xff] }
  0x9a   : > { %v492_v48 = vadd.f32 %v474_v33, %v300_v21  ;;  %v549_v43 = vadd.f32 %v531_v38, %v339_v26  ;;  %v606_v49 = vadd.f32 %v588_v35, %v378_v27  ;;  %v759_v50 = vmul.f32 %v1394_v31, %v1871_v57  ;;  %v1376_v23 = vld [vmem:[%s1768_s13 + $0x578] sm:$0xff]  ;;  %v1395_v30 = vld [vmem:[%s1768_s13 + $0x608] sm:$0xff] }
  0x9b   : > { %v1058_v53 = vadd.f32 %v1040_v39, %v1022_v32  ;;  %v663_v54 = vadd.f32 %v645_v42, %v435_v40  ;;  %v816_v55 = vmul.f32 %v1413_v36, %v1878_v63  ;;  %v873_v56 = vmul.f32 %v1432_v37, %v1884_v7  ;;  %v1414_v31 = vld [vmem:[%s1768_s13 + $0x698] sm:$0xff]  ;;  %v1433_v36 = vld [vmem:[%s1768_s13 + $0x728] sm:$0xff] }
  0x9c   : > { %v720_v61 = vadd.f32 %v702_v44, %v492_v48  ;;  %v777_v62 = vadd.f32 %v759_v50, %v549_v43  ;;  %v930_v0 = vmul.f32 %v1451_v45, %v1889_v13  ;;  %v987_v1 = vmul.f32 %v1470_v46, %v1896_v20  ;;  %v1452_v37 = vld [vmem:[%s1768_s13 + $0x7b8] sm:$0xff]  ;;  %v1471_v45 = vld [vmem:[%s1768_s13 + $0x848] sm:$0xff]  ;;  %v243_v50 = vld [vmem:[%s1768_s13 + $0x70] sm:$0xff] }
  0x9d   : > { %v1078_v8 = vadd.f32 %v1904_v28, %v1058_v53  ;;  %v834_v9 = vadd.f32 %v816_v55, %v606_v49  ;;  %v891_v10 = vadd.f32 %v873_v56, %v663_v54  ;;  %v262_v12 = vmul.f32 %v1782_v2, %v242_v51  ;;  %v1225_v51 = vld [vmem:[%s1768_s13 + $0x100] sm:$0xff] }
  0x9e   : > { %v948_v16 = vadd.f32 %v930_v0, %v720_v61  ;;  %v1005_v18 = vadd.f32 %v987_v1, %v777_v62  ;;  %v301_v19 = vmul.f32 %v1224_v58, %v1789_v6  ;;  %v340_v21 = vmul.f32 %v1243_v59, %v1797_v11  ;;  %v1244_v58 = vld [vmem:[%s1768_s13 + $0x190] sm:$0xff]  ;;  %v1263_v59 = vld [vmem:[%s1768_s13 + $0x220] sm:$0xff] }
  0x9f   : > { %1096 = vst [vmem:[%s1945_s23 + $0x58] sm:$0xff] %v1078_v8  ;;  %v379_v24 = vmul.f32 %v1262_v60, %v1806_v17  ;;  %v418_v25 = vmul.f32 %v1281_v3, %v1814_v22  ;;  %v475_v26 = vmul.f32 %v1300_v4, %v1825_v29  ;;  %v532_v27 = vmul.f32 %v1319_v5, %v1836_v34  ;;  %v1282_v60 = vld [vmem:[%s1768_s13 + $0x2b0] sm:$0xff]  ;;  %v1301_v3 = vld [vmem:[%s1768_s13 + $0x340] sm:$0xff] }
  0xa0   : > { %v1023_v32 = vadd.f32 %v948_v16, %v891_v10  ;;  %v1041_v33 = vadd.f32 %v1005_v18, %v834_v9  ;;  %v589_v38 = vmul.f32 %v1338_v14, %v1848_v41  ;;  %v646_v35 = vmul.f32 %v1357_v15, %v1856_v47  ;;  %v1320_v4 = vld [vmem:[%s1768_s13 + $0x3d0] sm:$0xff]  ;;  %v1339_v5 = vld [vmem:[%s1768_s13 + $0x460] sm:$0xff] }
  0xa1   : > { %v436_v39 = vadd.f32 %v418_v25, %v262_v12  ;;  %v493_v40 = vadd.f32 %v475_v26, %v301_v19  ;;  %v550_v42 = vadd.f32 %v532_v27, %v340_v21  ;;  %v703_v44 = vmul.f32 %v1376_v23, %v1863_v52  ;;  %v1358_v14 = vld [vmem:[%s1768_s13 + $0x4f0] sm:$0xff]  ;;  %v1377_v15 = vld [vmem:[%s1768_s13 + $0x580] sm:$0xff] }
  0xa2   : > { %v1059_v46 = vadd.f32 %v1041_v33, %v1023_v32  ;;  %v607_v48 = vadd.f32 %v589_v38, %v379_v24  ;;  %v760_v43 = vmul.f32 %v1395_v30, %v1871_v57  ;;  %v817_v49 = vmul.f32 %v1414_v31, %v1878_v63  ;;  %v1396_v23 = vld [vmem:[%s1768_s13 + $0x610] sm:$0xff]  ;;  %v1415_v30 = vld [vmem:[%s1768_s13 + $0x6a0] sm:$0xff] }
  0xa3   : > { %v664_v53 = vadd.f32 %v646_v35, %v436_v39  ;;  %v721_v54 = vadd.f32 %v703_v44, %v493_v40  ;;  %v874_v55 = vmul.f32 %v1433_v36, %v1884_v7  ;;  %v931_v56 = vmul.f32 %v1452_v37, %v1889_v13  ;;  %v1434_v31 = vld [vmem:[%s1768_s13 + $0x730] sm:$0xff]  ;;  %v1453_v36 = vld [vmem:[%s1768_s13 + $0x7c0] sm:$0xff] }
  0xa4   : > { %v1079_v61 = vadd.f32 %v1904_v28, %v1059_v46  ;;  %v778_v62 = vadd.f32 %v760_v43, %v550_v42  ;;  %v835_v0 = vadd.f32 %v817_v49, %v607_v48  ;;  %v988_v1 = vmul.f32 %v1471_v45, %v1896_v20  ;;  %v1472_v37 = vld [vmem:[%s1768_s13 + $0x850] sm:$0xff]  ;;  %v244_v45 = vld [vmem:[%s1768_s13 + $0x78] sm:$0xff] }
  0xa5   : > { %v892_v8 = vadd.f32 %v874_v55, %v664_v53  ;;  %v949_v9 = vadd.f32 %v931_v56, %v721_v54  ;;  %v263_v10 = vmul.f32 %v1782_v2, %v243_v50  ;;  %v302_v12 = vmul.f32 %v1225_v51, %v1789_v6  ;;  %v1226_v50 = vld [vmem:[%s1768_s13 + $0x108] sm:$0xff]  ;;  %v1245_v51 = vld [vmem:[%s1768_s13 + $0x198] sm:$0xff] }
  0xa6   : > { %1097 = vst [vmem:[%s1945_s23 + $0x60] sm:$0xff] %v1079_v61  ;;  %v1006_v16 = vadd.f32 %v988_v1, %v778_v62  ;;  %v341_v18 = vmul.f32 %v1244_v58, %v1797_v11  ;;  %v380_v19 = vmul.f32 %v1263_v59, %v1806_v17  ;;  %v419_v21 = vmul.f32 %v1282_v60, %v1814_v22  ;;  %v1264_v53 = vld [vmem:[%s1768_s13 + $0x228] sm:$0xff]  ;;  %v1283_v59 = vld [vmem:[%s1768_s13 + $0x2b8] sm:$0xff] }
  0xa7   : > { %v1024_v24 = vadd.f32 %v949_v9, %v892_v8  ;;  %v476_v25 = vmul.f32 %v1301_v3, %v1825_v29  ;;  %v533_v26 = vmul.f32 %v1320_v4, %v1836_v34  ;;  %v590_v27 = vmul.f32 %v1339_v5, %v1848_v41  ;;  %v1302_v60 = vld [vmem:[%s1768_s13 + $0x348] sm:$0xff]  ;;  %v1321_v61 = vld [vmem:[%s1768_s13 + $0x3d8] sm:$0xff] }
  0xa8   : > { %v1042_v32 = vadd.f32 %v1006_v16, %v835_v0  ;;  %v437_v33 = vadd.f32 %v419_v21, %v263_v10  ;;  %v647_v38 = vmul.f32 %v1358_v14, %v1856_v47  ;;  %v704_v35 = vmul.f32 %v1377_v15, %v1863_v52  ;;  %v1340_v4 = vld [vmem:[%s1768_s13 + $0x468] sm:$0xff]  ;;  %v1359_v5 = vld [vmem:[%s1768_s13 + $0x4f8] sm:$0xff] }
  0xa9   : > { %v494_v39 = vadd.f32 %v476_v25, %v302_v12  ;;  %v551_v40 = vadd.f32 %v533_v26, %v341_v18  ;;  %v608_v42 = vadd.f32 %v590_v27, %v380_v19  ;;  %v761_v44 = vmul.f32 %v1396_v23, %v1871_v57  ;;  %v1378_v14 = vld [vmem:[%s1768_s13 + $0x588] sm:$0xff]  ;;  %v1397_v21 = vld [vmem:[%s1768_s13 + $0x618] sm:$0xff] }
  0xaa   : > { %v1060_v46 = vadd.f32 %v1042_v32, %v1024_v24  ;;  %v665_v48 = vadd.f32 %v647_v38, %v437_v33  ;;  %v818_v43 = vmul.f32 %v1415_v30, %v1878_v63  ;;  %v875_v49 = vmul.f32 %v1434_v31, %v1884_v7  ;;  %v1416_v23 = vld [vmem:[%s1768_s13 + $0x6a8] sm:$0xff]  ;;  %v1435_v30 = vld [vmem:[%s1768_s13 + $0x738] sm:$0xff] }
  0xab   : > { %v722_v54 = vadd.f32 %v704_v35, %v494_v39  ;;  %v779_v55 = vadd.f32 %v761_v44, %v551_v40  ;;  %v932_v56 = vmul.f32 %v1453_v36, %v1889_v13  ;;  %v989_v58 = vmul.f32 %v1472_v37, %v1896_v20  ;;  %v1454_v31 = vld [vmem:[%s1768_s13 + $0x7c8] sm:$0xff]  ;;  %v1473_v36 = vld [vmem:[%s1768_s13 + $0x858] sm:$0xff]  ;;  %v245_v44 = vld [vmem:[%s1768_s13 + $0x80] sm:$0xff] }
  0xac   : > { %v1080_v62 = vadd.f32 %v1904_v28, %v1060_v46  ;;  %v836_v0 = vadd.f32 %v818_v43, %v608_v42  ;;  %v893_v1 = vadd.f32 %v875_v49, %v665_v48  ;;  %v264_v3 = vmul.f32 %v1782_v2, %v244_v45  ;;  %v1227_v45 = vld [vmem:[%s1768_s13 + $0x110] sm:$0xff] }
  0xad   : > { %v950_v8 = vadd.f32 %v932_v56, %v722_v54  ;;  %v1007_v9 = vadd.f32 %v989_v58, %v779_v55  ;;  %v303_v10 = vmul.f32 %v1226_v50, %v1789_v6  ;;  %v342_v12 = vmul.f32 %v1245_v51, %v1797_v11  ;;  %v1246_v50 = vld [vmem:[%s1768_s13 + $0x1a0] sm:$0xff]  ;;  %v1265_v51 = vld [vmem:[%s1768_s13 + $0x230] sm:$0xff] }
  0xae   : > { %1098 = vst [vmem:[%s1945_s23 + $0x68] sm:$0xff] %v1080_v62  ;;  %v381_v15 = vmul.f32 %v1264_v53, %v1806_v17  ;;  %v420_v16 = vmul.f32 %v1283_v59, %v1814_v22  ;;  %v477_v18 = vmul.f32 %v1302_v60, %v1825_v29  ;;  %v534_v19 = vmul.f32 %v1321_v61, %v1836_v34  ;;  %v1284_v53 = vld [vmem:[%s1768_s13 + $0x2c0] sm:$0xff]  ;;  %v1303_v59 = vld [vmem:[%s1768_s13 + $0x350] sm:$0xff] }
  0xaf   : > { %v1025_v24 = vadd.f32 %v950_v8, %v893_v1  ;;  %v1043_v25 = vadd.f32 %v1007_v9, %v836_v0  ;;  %v591_v26 = vmul.f32 %v1340_v4, %v1848_v41  ;;  %v648_v27 = vmul.f32 %v1359_v5, %v1856_v47  ;;  %v1322_v60 = vld [vmem:[%s1768_s13 + $0x3e0] sm:$0xff]  ;;  %v1341_v61 = vld [vmem:[%s1768_s13 + $0x470] sm:$0xff] }
  0xb0   : > { %v438_v32 = vadd.f32 %v420_v16, %v264_v3  ;;  %v495_v33 = vadd.f32 %v477_v18, %v303_v10  ;;  %v552_v38 = vadd.f32 %v534_v19, %v342_v12  ;;  %v705_v35 = vmul.f32 %v1378_v14, %v1863_v52  ;;  %v1360_v4 = vld [vmem:[%s1768_s13 + $0x500] sm:$0xff]  ;;  %v1379_v5 = vld [vmem:[%s1768_s13 + $0x590] sm:$0xff] }
  0xb1   : > { %v1061_v37 = vadd.f32 %v1043_v25, %v1025_v24  ;;  %v609_v39 = vadd.f32 %v591_v26, %v381_v15  ;;  %v762_v40 = vmul.f32 %v1397_v21, %v1871_v57  ;;  %v819_v42 = vmul.f32 %v1416_v23, %v1878_v63  ;;  %v1398_v14 = vld [vmem:[%s1768_s13 + $0x620] sm:$0xff]  ;;  %v1417_v21 = vld [vmem:[%s1768_s13 + $0x6b0] sm:$0xff] }
  0xb2   : > { %v666_v46 = vadd.f32 %v648_v27, %v438_v32  ;;  %v723_v48 = vadd.f32 %v705_v35, %v495_v33  ;;  %v876_v43 = vmul.f32 %v1435_v30, %v1884_v7  ;;  %v933_v49 = vmul.f32 %v1454_v31, %v1889_v13  ;;  %v1436_v23 = vld [vmem:[%s1768_s13 + $0x740] sm:$0xff]  ;;  %v1455_v30 = vld [vmem:[%s1768_s13 + $0x7d0] sm:$0xff] }
  0xb3   : > { %v1081_v54 = vadd.f32 %v1904_v28, %v1061_v37  ;;  %v780_v55 = vadd.f32 %v762_v40, %v552_v38  ;;  %v837_v56 = vadd.f32 %v819_v42, %v609_v39  ;;  %v990_v58 = vmul.f32 %v1473_v36, %v1896_v20  ;;  %v1474_v31 = vld [vmem:[%s1768_s13 + $0x860] sm:$0xff]  ;;  %v246_v36 = vld [vmem:[%s1768_s13 + $0x88] sm:$0xff] }
  0xb4   : > { %v894_v62 = vadd.f32 %v876_v43, %v666_v46  ;;  %v951_v0 = vadd.f32 %v933_v49, %v723_v48  ;;  %v265_v1 = vmul.f32 %v1782_v2, %v245_v44  ;;  %v304_v3 = vmul.f32 %v1227_v45, %v1789_v6  ;;  %v1228_v44 = vld [vmem:[%s1768_s13 + $0x118] sm:$0xff]  ;;  %v1247_v45 = vld [vmem:[%s1768_s13 + $0x1a8] sm:$0xff] }
  0xb5   : > { %1099 = vst [vmem:[%s1945_s23 + $0x70] sm:$0xff] %v1081_v54  ;;  %v1008_v8 = vadd.f32 %v990_v58, %v780_v55  ;;  %v343_v9 = vmul.f32 %v1246_v50, %v1797_v11  ;;  %v382_v10 = vmul.f32 %v1265_v51, %v1806_v17  ;;  %v421_v12 = vmul.f32 %v1284_v53, %v1814_v22  ;;  %v1266_v46 = vld [vmem:[%s1768_s13 + $0x238] sm:$0xff]  ;;  %v1285_v51 = vld [vmem:[%s1768_s13 + $0x2c8] sm:$0xff] }
  0xb6   : > { %v1026_v15 = vadd.f32 %v951_v0, %v894_v62  ;;  %v478_v16 = vmul.f32 %v1303_v59, %v1825_v29  ;;  %v535_v18 = vmul.f32 %v1322_v60, %v1836_v34  ;;  %v592_v19 = vmul.f32 %v1341_v61, %v1848_v41  ;;  %v1304_v53 = vld [vmem:[%s1768_s13 + $0x358] sm:$0xff]  ;;  %v1323_v54 = vld [vmem:[%s1768_s13 + $0x3e8] sm:$0xff] }
  0xb7   : > { %v1044_v24 = vadd.f32 %v1008_v8, %v837_v56  ;;  %v439_v25 = vadd.f32 %v421_v12, %v265_v1  ;;  %v649_v26 = vmul.f32 %v1360_v4, %v1856_v47  ;;  %v706_v27 = vmul.f32 %v1379_v5, %v1863_v52  ;;  %v1342_v60 = vld [vmem:[%s1768_s13 + $0x478] sm:$0xff]  ;;  %v1361_v61 = vld [vmem:[%s1768_s13 + $0x508] sm:$0xff] }
  0xb8   : > { %v496_v32 = vadd.f32 %v478_v16, %v304_v3  ;;  %v553_v33 = vadd.f32 %v535_v18, %v343_v9  ;;  %v610_v38 = vadd.f32 %v592_v19, %v382_v10  ;;  %v763_v35 = vmul.f32 %v1398_v14, %v1871_v57  ;;  %v1380_v4 = vld [vmem:[%s1768_s13 + $0x598] sm:$0xff]  ;;  %v1399_v10 = vld [vmem:[%s1768_s13 + $0x628] sm:$0xff] }
  0xb9   : > { %v1062_v37 = vadd.f32 %v1044_v24, %v1026_v15  ;;  %v667_v39 = vadd.f32 %v649_v26, %v439_v25  ;;  %v820_v40 = vmul.f32 %v1417_v21, %v1878_v63  ;;  %v877_v42 = vmul.f32 %v1436_v23, %v1884_v7  ;;  %v1418_v12 = vld [vmem:[%s1768_s13 + $0x6b8] sm:$0xff] }
  0xba   : > { %v724_v48 = vadd.f32 %v706_v27, %v496_v32  ;;  %v781_v43 = vadd.f32 %v763_v35, %v553_v33  ;;  %v934_v49 = vmul.f32 %v1455_v30, %v1889_v13  ;;  %v991_v50 = vmul.f32 %v1474_v31, %v1896_v20  ;;  %v1456_v18 = vld [vmem:[%s1768_s13 + $0x7d8] sm:$0xff] }
  0xbb   : > { %v1082_v55 = vadd.f32 %v1904_v28, %v1062_v37  ;;  %v838_v56 = vadd.f32 %v820_v40, %v610_v38  ;;  %v895_v58 = vadd.f32 %v877_v42, %v667_v39  ;;  %v266_v59 = vmul.f32 %v1782_v2, %v246_v36 }
  0xbc   : > { %v952_v62 = vadd.f32 %v934_v49, %v724_v48  ;;  %v1009_v0 = vadd.f32 %v991_v50, %v781_v43  ;;  %v305_v1 = vmul.f32 %v1228_v44, %v1789_v6  ;;  %v344_v3 = vmul.f32 %v1247_v45, %v1797_v11  ;;  %v1437_v11 = vld [vmem:[%s1768_s13 + $0x748] sm:$0xff] }
  0xbd   : > { %1100 = vst [vmem:[%s1945_s23 + $0x78] sm:$0xff] %v1082_v55  ;;  %v383_v5 = vmul.f32 %v1266_v46, %v1806_v17  ;;  %v422_v8 = vmul.f32 %v1285_v51, %v1814_v22  ;;  %v479_v9 = vmul.f32 %v1304_v53, %v1825_v29  ;;  %v536_v2 = vmul.f32 %v1323_v54, %v1836_v34  ;;  %v1475_v22 = vld [vmem:[%s1768_s13 + $0x868] sm:$0xff]  ;;  %s1481_s13 = smul.u32 2304, %s1687_s2  ;;  %s1640_s2 = smov [#allocation8]  }
  0xbe   : > { %v1027_v14 = vadd.f32 %v952_v62, %v895_v58  ;;  %v1045_v15 = vadd.f32 %v1009_v0, %v838_v56  ;;  %v593_v16 = vmul.f32 %v1342_v60, %v1848_v41  ;;  %v650_v6 = vmul.f32 %v1361_v61, %v1856_v47  ;;  %s1567_s20 = sshll.u32 %s1640_s2, 4  ;;  %s1568_s20 = int_to_ptr.vmem [resolvable:$false] %s1567_s20 }
  0xbf   : > { %v440_v19 = vadd.f32 %v422_v8, %v266_v59  ;;  %v497_v21 = vadd.f32 %v479_v9, %v305_v1  ;;  %v554_v17 = vadd.f32 %v536_v2, %v344_v3  ;;  %v707_v23 = vmul.f32 %v1380_v4, %v1863_v52  ;;  %s2433_s11 = scalar_lea.hbm %s2483_s3, %s1481_s13  ;;  %s1569_s21 = scalar_lea.vmem %s1568_s20, 4608 }
  0xc0   : > { %v1063_v29 = vadd.f32 %v1045_v15, %v1027_v14  ;;  %v611_v24 = vadd.f32 %v593_v16, %v383_v5  ;;  %v764_v34 = vmul.f32 %v1399_v10, %v1871_v57  ;;  %v821_v25 = vmul.f32 %v1418_v12, %v1878_v63  ;;  %p1570_p6 = scmp.lt.s32.totalorder %s2435_s27, %s1568_s20  ;;  %p1571_p7 = scmp.lt.s32.totalorder %s1569_s21, %s1563_s18 }
  0xc1   : > { %v668_v41 = vadd.f32 %v650_v6, %v440_v19  ;;  %v725_v26 = vadd.f32 %v707_v23, %v497_v21  ;;  %v878_v47 = vmul.f32 %v1437_v11, %v1884_v7  ;;  %v935_v27 = vmul.f32 %v1456_v18, %v1889_v13 }
  0xc2   : > { %v1083_v30 = vadd.f32 %v1904_v28, %v1063_v29  ;;  %v782_v52 = vadd.f32 %v764_v34, %v554_v17  ;;  %v839_v31 = vadd.f32 %v821_v25, %v611_v24  ;;  %v992_v32 = vmul.f32 %v1475_v22, %v1896_v20  ;;  %p1572_p8 = por %p1571_p7, %p1570_p6 }
  0xc3   : > { %v896_v33 = vadd.f32 %v878_v47, %v668_v41  ;;  %v953_v57 = vadd.f32 %v935_v27, %v725_v26 }
  0xc4   : > { %1101 = vst [vmem:[%s1945_s23 + $0x80] sm:$0xff] %v1083_v30  ;;  %v1010_v63 = vadd.f32 %v992_v32, %v782_v52  ;;  %p1573_p9 = pnand %p1572_p8, %p1566_p5 }
  0xc5   : > { %v1028_v38 = vadd.f32 %v953_v57, %v896_v33 }
  0xc6   : > { %v1046_v35 = vadd.f32 %v1010_v63, %v839_v31 }
  0xc8   : > { %v1064_v7 = vadd.f32 %v1046_v35, %v1028_v38 }
  0xca   : > { %v1084_v13 = vadd.f32 %v1904_v28, %v1064_v7 }
  0xcc   : > { %1102 = vst [vmem:[%s1945_s23 + $0x88] sm:$0xff] %v1084_v13 }
  0xcd   : > { %1576 = shalt.err (!%p1573_p9)
}
  0xce   : > { %s1577_s28 = scalar_lea.hbm %s2433_s11, 2304  ;;  %s1581_s5 = scalar_lea.hbm %s2483_s3, 4608 }
  0xcf   : > { %p1578_p10 = scmp.ne.s32.totalorder %s2433_s11, %s1577_s28  ;;  %p1582_p2 = scmp.lt.s32.totalorder %s2433_s11, %s2483_s3 }
  0xd0   : > { %p1583_p3 = scmp.lt.s32.totalorder %s1581_s5, %s1577_s28 }
  0xd1   : > { %p1579_p13 = pnand %p1578_p10, %p1718_p11 }
  0xd2   : > { %p1584_p4 = por %p1583_p3, %p1582_p2 }
  0xd3   : > { %p1580_p1 = pneg %p1579_p13 }
  0xd5   : > { %p1585_p5 = pnand %p1584_p4, %p1580_p1 }
  0xd7   : > { %1588 = shalt.err (!%p1585_p5)
}
  0xd8   : > { %s1641_s9 = smov 128   ;;  %s1642_s10 = smov 8  }
  0xd9   : > { %1498 = dma.vmem_to_hbm [thread:$0]  (%p1718_p11), %s2435_s27, 2304, %s2433_s11, %s1104_s12, %s1641_s9, %s1641_s9, %s1642_s10  }
  0xda PF: > { %s1132_s23 = sand.u32 1, %s1619_s14   ;;  %p1505_p6 = pnand %p1205_p0, %p1722_p12 }
  0xdb   : > { %s1133_s13 = scalar_lea.sflag [#allocation5], %s1132_s23 }
  0xdc   : > { %p1506_p7 = pneg %p1505_p6 }
  0xde   : > { %1614 = dma.done.wait (%p1506_p7), %s1133_s13, 2304  }
  0xdf   : > { %1616 = vsyncadd (%p1506_p7), %s1133_s13, 4294964992  ;;  %p18_p8 = scmp.ge.s32.totalorder %s1691_s19, 4   ;;  %s2489_s14 = smov %s1623_s15 }
  0xe0   : > { %s2490_s15 = smov %s1627_s16  ;;  %s2491_s16 = smov %s1703_s22 }
  0xe1   : > { %s2492_s17 = smov %s1691_s19  ;;  %20 = sbr.rel (!%p18_p8) target bundleno = 8 (0x8), region = 101 }
  0xe6   :  { %1138 = vsyncpa [#allocation4], 1 }
  0xe7   :  { %1140 = vsyncpa [#allocation4 + $0x1], 1 }
  0xe8   :  { %1141 = vsyncpa [#allocation5], 1 }
  0xe9   :  { %1143 = vsyncpa [#allocation5 + $0x1], 1 }
  0xea   :  { %1144 = vsyncpa [#allocation6], 1 }
  0xeb   :  { %1146 = vsyncpa [#allocation6 + $0x1], 1 }

</bundles_post_ra>
